<compile_context>
chip_gen: v5e
topology: v5e:2x2
jax: 0.10.0
libtpu: 0.0.40
codegen_flags: <defaults>
</compile_context>

<pallas_src>
import functools

import jax
import jax.numpy as jnp
from jax.experimental import pallas as pl
from jax.experimental.pallas import tpu as pltpu

_BN_EPS = 1e-5
_LANES = 128
_SUBLANES = 8


def _round_up(x, m):
    return ((x + m - 1) // m) * m


# ----------------------------------------------------------------------------
# Fused Pallas kernel
# ----------------------------------------------------------------------------

def _fused_block_kernel(
    x_ref,            # (1, H+2, Wp, Cin)  zero-padded input image (resident per n)
    w_exp_ref,        # (Cin, Ch)  bf16, BN scale folded in
    b1_ref,           # (1, Ch)    f32 shift
    w_dw_ref,         # (3, 3, Ch) f32, BN scale folded in
    b2_ref,           # (1, 1, Ch) f32 shift
    w_proj_ref,       # (Ch, Cp)   bf16, BN scale folded in
    b3_ref,           # (1, Cp)    f32 shift
    o_ref,            # (1, th, Wob, Cp)
    h_scratch,        # VMEM (band_in_h, Wp, Ch) f32 : expanded activations, one band
    *,
    stride, th, H, W, has_expand):
    band = pl.program_id(1)
    band_in_h, Wp, Ch = h_scratch.shape
    Wob = o_ref.shape[2]
    step = stride * th
    row0 = pl.multiple_of(band * step, step)   # first padded-input row of this band

    # ---- Stage 1: 1x1 expand conv + BN(shift) + ReLU, into the VMEM scratch ----
    x_band = x_ref[0, pl.ds(row0, band_in_h), :, :]            # (band_in_h, Wp, Cin)
    if has_expand:
        x2d = x_band.reshape(band_in_h * Wp, x_band.shape[-1])  # free: Wp % 8 == 0
        y = jnp.dot(x2d.astype(jnp.bfloat16), w_exp_ref[...],
                    preferred_element_type=jnp.float32)
        y = jnp.maximum(y + b1_ref[...], 0.0)
        y = y.reshape(band_in_h, Wp, Ch)                        # free: Wp % 8 == 0
        # Zero the conv halo with a pre-store select (no partial stores): the
        # zero-padded input would otherwise become relu(shift1) != 0 after the
        # (folded) BN shift + ReLU.
        col = jax.lax.broadcasted_iota(jnp.int32, (band_in_h, Wp, Ch), 1)
        row = jax.lax.broadcasted_iota(jnp.int32, (band_in_h, Wp, Ch), 0) + row0
        interior = (col >= 1) & (col <= W) & (row >= 1) & (row <= H)
        h_scratch[...] = jnp.where(interior, y, 0.0)
    else:
        # Identity expand: padded zeros stay zero (no bias / ReLU), no mask needed.
        h_scratch[...] = x_band.astype(jnp.float32)

    # ---- Stage 2: 3x3 depthwise conv (direct stride) + BN(shift) + ReLU --------
    def _tap(start, size):
        # stride-2 is computed directly: no over-compute + no post-hoc subsample.
        return pl.ds(start, size) if stride == 1 else pl.ds(start, size, stride)

    wdw = w_dw_ref[...]                                        # load once (3, 3, Ch)
    acc = None
    for ki in range(3):
        for kj in range(3):
            tap = h_scratch[_tap(ki, th), _tap(kj, Wob), :]
            term = tap * wdw[ki, kj, :]
            acc = term if acc is None else acc + term
    d = jnp.maximum(acc + b2_ref[...], 0.0)                    # (th, Wob, Ch)

    # ---- Stage 3: 1x1 project conv + BN(shift) (no ReLU) -----------------------
    d2 = d.reshape(th * Wob, Ch).astype(jnp.bfloat16)          # free: Wob % 8 == 0
    z = jnp.dot(d2, w_proj_ref[...], preferred_element_type=jnp.float32)
    z = z + b3_ref[...]
    o_ref[...] = z.reshape(1, th, Wob, z.shape[-1]).astype(o_ref.dtype)


# ----------------------------------------------------------------------------
# Wrapper helpers
# ----------------------------------------------------------------------------

def _vmem_limit_bytes():
    """Generation-aware VMEM limit (v5e/v6e: 128 MiB phys -> 96 MiB; v7x: 64 -> 48)."""
    try:
        cap = int(pltpu.get_tpu_info().vmem_capacity_bytes)
    except Exception:
        cap = 64 << 20   # conservative fallback: works on every generation
    return max(32 << 20, min(cap * 3 // 4, 96 << 20))


def _pick_band_rows(h_out, w_ob, w_p, hp, cin, ch, cp, stride,
                    *, budget_bytes, target=32):
    """Largest divisor of h_out <= `target` whose working set fits the budget.

    Accounts for the 128-lane VMEM padding + double buffering of the resident
    (per-batch) padded input image and of the weights, not just the band scratch.
    """
    cin_l = _round_up(cin, _LANES)
    ch_l = _round_up(ch, _LANES)
    cp_l = _round_up(cp, _LANES)

    fixed = 2 * hp * w_p * cin_l * 4                                # resident image, 2 bufs
    fixed += 2 * _round_up(cin, _SUBLANES) * ch_l * 2               # bf16 expand weight
    fixed += 2 * ch_l * cp_l * 2                                    # bf16 project weight
    fixed += 2 * 3 * _SUBLANES * ch_l * 4                           # f32 depthwise weight
    fixed += 6 * _SUBLANES * max(ch_l, cp_l) * 4                    # shift rows

    def per_band(d):
        band_in_h = stride * (d - 1) + 3
        scratch = band_in_h * w_p * ch_l * 4                        # h_scratch (1 buf)
        work = 2 * band_in_h * w_p * ch_l * 4                       # stage-1 value + select
        dw = 2 * d * w_ob * ch_l * 4                                # dw acc + activation
        out_b = 2 * d * w_ob * cp_l * 4                             # output band, 2 bufs
        return scratch + work + dw + out_b

    best = 1
    for d in range(1, min(h_out, target) + 1):
        if h_out % d == 0 and fixed + per_band(d) <= budget_bytes:
            best = d
    return best


def inverted_residual_forward(x_nhwc, params, *, strides, in_ch, out_ch, pw_ratio=6):
    assert strides in (1, 2)
    # Exact reproduction of the PyTorch module's (unusual) shortcut condition.
    use_shortcut = (strides == 2 and in_ch == out_ch)

    N, H, W, cin = x_nhwc.shape
    assert cin == in_ch
    hidden = int(round(in_ch * pw_ratio))
    has_expand = (pw_ratio != 1)

    h_out = (H - 1) // strides + 1
    w_out = (W - 1) // strides + 1

    # Lane/sublane friendly padded sizes (make in-kernel reshapes layout-free).
    w_ob = _round_up(w_out, _SUBLANES)                                # output width
    w_p = _round_up(max(W + 2, strides * (w_ob - 1) + 3), _SUBLANES)  # input width
    ch = _round_up(hidden, _LANES) if has_expand else hidden          # hidden lanes
    # Lane-dense output stores beat masked vst.msk even with a few-x HBM inflation;
    # keep masked stores only for truly tiny Cout.
    cp = _round_up(out_ch, _LANES) if out_ch >= 16 else out_ch

    vmem_limit = _vmem_limit_bytes()
    hp = H + 2
    th = _pick_band_rows(h_out, w_ob, w_p, hp, in_ch, ch, cp, strides,
                         budget_bytes=int(vmem_limit * 0.8))
    n_bands = h_out // th
    band_in_h = strides * (th - 1) + 3

    # ---- padded / BN-folded operands (pure layout glue, O(input)+O(weights)) ----
    x_pad = jnp.pad(x_nhwc, ((0, 0), (1, 1), (1, w_p - W - 1), (0, 0)))

    def pad_to(a, new, axis):
        widths = [(0, 0)] * a.ndim
        widths[axis] = (0, new - a.shape[axis])
        return jnp.pad(a, widths)

    if has_expand:
        w_exp = params["w_exp"] * params["scale1"][None, :]           # fold BN scale
        w_exp = pad_to(w_exp, ch, 1).astype(jnp.bfloat16)
        b1 = pad_to(params["shift1"], ch, 0).reshape(1, ch).astype(jnp.float32)
    else:
        w_exp = jnp.zeros((in_ch, ch), jnp.bfloat16)
        b1 = jnp.zeros((1, ch), jnp.float32)
    w_dw = params["w_dw"] * params["scale2"][None, None, :]           # fold BN scale
    w_dw = pad_to(w_dw, ch, 2).astype(jnp.float32)
    b2 = pad_to(params["shift2"], ch, 0).reshape(1, 1, ch).astype(jnp.float32)
    w_proj = params["w_proj"] * params["scale3"][None, :]             # fold BN scale
    w_proj = pad_to(pad_to(w_proj, ch, 0), cp, 1).astype(jnp.bfloat16)
    b3 = pad_to(params["shift3"], cp, 0).reshape(1, cp).astype(jnp.float32)

    kernel = functools.partial(
        _fused_block_kernel,
        stride=strides, th=th, H=H, W=W, has_expand=has_expand)

    out = pl.pallas_call(
        kernel,
        out_shape=jax.ShapeDtypeStruct((N, h_out, w_ob, cp), x_nhwc.dtype),
        grid_spec=pltpu.PrefetchScalarGridSpec(
            num_scalar_prefetch=0,
            grid=(N, n_bands),
            in_specs=[
                # whole padded image per batch element; index ignores the band
                # axis so it is DMA'd once per n and stays resident across bands.
                pl.BlockSpec((1, hp, w_p, in_ch), lambda n, b: (n, 0, 0, 0)),
                pl.BlockSpec((in_ch, ch), lambda n, b: (0, 0)),
                pl.BlockSpec((1, ch), lambda n, b: (0, 0)),
                pl.BlockSpec((3, 3, ch), lambda n, b: (0, 0, 0)),
                pl.BlockSpec((1, 1, ch), lambda n, b: (0, 0, 0)),
                pl.BlockSpec((ch, cp), lambda n, b: (0, 0)),
                pl.BlockSpec((1, cp), lambda n, b: (0, 0)),
            ],
            out_specs=pl.BlockSpec((1, th, w_ob, cp), lambda n, b: (n, b, 0, 0)),
            scratch_shapes=[pltpu.VMEM((band_in_h, w_p, ch), jnp.float32)],
        ),
        compiler_params=pltpu.CompilerParams(
            # Batch axis is the only "parallel" axis so megacore partitioning lands
            # on N and the resident-image residency is not duplicated per core.
            dimension_semantics=("parallel", "arbitrary"),
            vmem_limit_bytes=vmem_limit),
    )(x_pad, w_exp, b1, w_dw, b2, w_proj, b3)

    if w_ob != w_out or cp != out_ch:
        out = out[:, :, :w_out, :out_ch]

    # TODO(synk): as in the PyTorch source, this shortcut only triggers with
    # strides==2 and in_ch==out_ch, where spatial shapes mismatch (same behavior
    # kept); if ever corrected to stride==1, fuse the add into the kernel store.
    return x_nhwc + out if use_shortcut else out


# ----------------------------------------------------------------------------
# Parameters (BN folded, eval-mode)
# ----------------------------------------------------------------------------

def _fold_bn(gamma, beta, mean, var):
    scale = gamma / jnp.sqrt(var + _BN_EPS)
    shift = beta - mean * scale
    return scale.astype(jnp.float32), shift.astype(jnp.float32)


def init_params(key, in_ch, out_ch, pw_ratio=6):
    hid = int(round(in_ch * pw_ratio))
    ks = jax.random.split(key, 16)

    def bn(k0, k1, k2, k3, c):
        gamma = 1.0 + 0.1 * jax.random.normal(k0, (c,), jnp.float32)
        beta = 0.1 * jax.random.normal(k1, (c,), jnp.float32)
        mean = 0.1 * jax.random.normal(k2, (c,), jnp.float32)
        var = jnp.abs(jax.random.normal(k3, (c,), jnp.float32)) + 0.5
        return _fold_bn(gamma, beta, mean, var)

    p = {}
    if pw_ratio != 1:
        # PyTorch Conv2d weight (hid, in_ch, 1, 1) -> matmul weight (in_ch, hid)
        p["w_exp"] = 0.1 * jax.random.normal(ks[0], (in_ch, hid), jnp.float32)
        p["scale1"], p["shift1"] = bn(ks[1], ks[2], ks[3], ks[4], hid)
    # PyTorch depthwise weight (hid, 1, 3, 3) -> (3, 3, hid)
    p["w_dw"] = 0.1 * jax.random.normal(ks[5], (3, 3, hid), jnp.float32)
    p["scale2"], p["shift2"] = bn(ks[6], ks[7], ks[8], ks[9], hid)
    # PyTorch Conv2d weight (out_ch, hid, 1, 1) -> (hid, out_ch)
    p["w_proj"] = 0.1 * jax.random.normal(ks[10], (hid, out_ch), jnp.float32)
    p["scale3"], p["shift3"] = bn(ks[11], ks[12], ks[13], ks[14], out_ch)
    return p


# ----------------------------------------------------------------------------
# Pure-JAX f32 reference (for correctness check)
# ----------------------------------------------------------------------------

def ref_forward(x_nhwc, p, *, strides, in_ch, out_ch, pw_ratio=6):
    use_shortcut = (strides == 2 and in_ch == out_ch)
    h = x_nhwc
    if pw_ratio != 1:
        h = jnp.einsum("nhwc,cd->nhwd", h, p["w_exp"])
        h = jnp.maximum(h * p["scale1"] + p["shift1"], 0.0)
    C = h.shape[-1]
    dw = p["w_dw"].reshape(3, 3, 1, C)
    h = jax.lax.conv_general_dilated(
        h, dw, window_strides=(strides, strides),
        padding=((1, 1), (1, 1)),
        dimension_numbers=("NHWC", "HWIO", "NHWC"),
        feature_group_count=C)
    h = jnp.maximum(h * p["scale2"] + p["shift2"], 0.0)
    h = jnp.einsum("nhwc,cd->nhwd", h, p["w_proj"])
    h = h * p["scale3"] + p["shift3"]
    return x_nhwc + h if use_shortcut else h


# ----------------------------------------------------------------------------

if __name__ == "__main__":
    in_ch, out_ch, strides, pw_ratio = 4, 4, 1, 6
    N, H, W = 2, 16, 16

    key = jax.random.PRNGKey(0)
    kx, kp = jax.random.split(key)
    # PyTorch-convention NCHW input, transposed once to the kernel's NHWC layout.
    x_nchw = jax.random.normal(kx, (N, in_ch, H, W), jnp.float32)
    x_nhwc = jnp.transpose(x_nchw, (0, 2, 3, 1))

    params = init_params(kp, in_ch, out_ch, pw_ratio)

    fwd = jax.jit(functools.partial(
        inverted_residual_forward,
        strides=strides, in_ch=in_ch, out_ch=out_ch, pw_ratio=pw_ratio))
    out = jax.block_until_ready(fwd(x_nhwc, params))

    ref = ref_forward(x_nhwc, params, strides=strides,
                      in_ch=in_ch, out_ch=out_ch, pw_ratio=pw_ratio)
    assert out.shape == ref.shape, (out.shape, ref.shape)
    err = float(jnp.max(jnp.abs(out - ref)))
    # bf16 matmul inputs (f32 accumulation) -> tolerance looser than a pure-f32 run.
    assert jnp.allclose(out, ref, atol=3e-2, rtol=3e-2), err

    print("KERNEL_OK")
</pallas_src>

<mosaic_0001>
module attributes {stable_mosaic.version = 11 : i64} {
  func.func @_fused_block_kernel(%arg0: i32, %arg1: i32, %arg2: memref<1x18x24x4xf32, #tpu.memory_space<vmem>>, %arg3: memref<4x128xbf16, #tpu.memory_space<vmem>>, %arg4: memref<1x128xf32, #tpu.memory_space<vmem>>, %arg5: memref<3x3x128xf32, #tpu.memory_space<vmem>>, %arg6: memref<1x1x128xf32, #tpu.memory_space<vmem>>, %arg7: memref<128x4xbf16, #tpu.memory_space<vmem>>, %arg8: memref<1x4xf32, #tpu.memory_space<vmem>>, %arg9: memref<1x16x16x4xf32, #tpu.memory_space<vmem>>, %arg10: memref<18x24x128xf32, #tpu.memory_space<vmem>>) attributes {dimension_semantics = [#tpu.dimension_semantics<parallel>, #tpu.dimension_semantics<arbitrary>], iteration_bounds = array<i64: 2, 1>, scalar_prefetch = 0 : i64, scratch_operands = 1 : i64, tpu.core_type = #tpu.core_type<tc>, window_params = [{transform_indices = @transform_0, window_bounds = array<i64: 1, 18, 24, 4>}, {pipeline_mode = #tpu.pipeline_mode<synchronous>, transform_indices = @transform_1, window_bounds = array<i64: 4, 128>}, {pipeline_mode = #tpu.pipeline_mode<synchronous>, transform_indices = @transform_2, window_bounds = array<i64: 1, 128>}, {pipeline_mode = #tpu.pipeline_mode<synchronous>, transform_indices = @transform_3, window_bounds = array<i64: 3, 3, 128>}, {pipeline_mode = #tpu.pipeline_mode<synchronous>, transform_indices = @transform_4, window_bounds = array<i64: 1, 1, 128>}, {pipeline_mode = #tpu.pipeline_mode<synchronous>, transform_indices = @transform_5, window_bounds = array<i64: 128, 4>}, {pipeline_mode = #tpu.pipeline_mode<synchronous>, transform_indices = @transform_6, window_bounds = array<i64: 1, 4>}, {transform_indices = @transform_7, window_bounds = array<i64: 1, 16, 16, 4>}]} {
    %c16_i32 = arith.constant 16 : i32
    %0 = arith.muli %arg1, %c16_i32 : i32
    %1 = tpu.assume_multiple %0, 16 : i32
    %c0 = arith.constant 0 : index
    %2 = arith.index_cast %1 : i32 to index
    %c0_0 = arith.constant 0 : index
    %c0_1 = arith.constant 0 : index
    %3 = vector.load %arg2[%c0, %2, %c0_0, %c0_1] : memref<1x18x24x4xf32, #tpu.memory_space<vmem>>, vector<1x18x24x4xf32>
    %4 = vector.shape_cast %3 : vector<1x18x24x4xf32> to vector<18x24x4xf32>
    %5 = vector.shape_cast %4 : vector<18x24x4xf32> to vector<432x4xf32>
    %6 = arith.truncf %5 : vector<432x4xf32> to vector<432x4xbf16>
    %c0_2 = arith.constant 0 : index
    %c0_3 = arith.constant 0 : index
    %7 = vector.load %arg3[%c0_2, %c0_3] : memref<4x128xbf16, #tpu.memory_space<vmem>>, vector<4x128xbf16>
    %cst = arith.constant dense<0.000000e+00> : vector<432x128xf32>
    %8 = tpu.matmul %6, %7, %cst {dimension_numbers = #tpu.dot_dimension_numbers<[1], [0], [0], [1], [0, 0, 1, 1], [], []>} : vector<432x4xbf16>, vector<4x128xbf16>, vector<432x128xf32> -> vector<432x128xf32>
    %c0_4 = arith.constant 0 : index
    %c0_5 = arith.constant 0 : index
    %9 = vector.load %arg4[%c0_4, %c0_5] : memref<1x128xf32, #tpu.memory_space<vmem>>, vector<1x128xf32>
    %10 = vector.broadcast %9 : vector<1x128xf32> to vector<432x128xf32>
    %11 = arith.addf %8, %10 : vector<432x128xf32>
    %cst_6 = arith.constant 0.000000e+00 : f32
    %12 = vector.broadcast %cst_6 : f32 to vector<432x128xf32>
    %13 = arith.maximumf %11, %12 : vector<432x128xf32>
    %14 = vector.shape_cast %13 : vector<432x128xf32> to vector<18x24x128xf32>
    %15 = tpu.iota {dimensions = array<i32: 1>} : vector<18x24x128xi32>
    %16 = tpu.iota {dimensions = array<i32: 0>} : vector<18x24x128xi32>
    %17 = vector.broadcast %1 : i32 to vector<18x24x128xi32>
    %18 = arith.addi %16, %17 : vector<18x24x128xi32>
    %c1_i32 = arith.constant 1 : i32
    %19 = vector.broadcast %c1_i32 : i32 to vector<18x24x128xi32>
    %20 = arith.cmpi sge, %15, %19 : vector<18x24x128xi32>
    %c16_i32_7 = arith.constant 16 : i32
    %21 = vector.broadcast %c16_i32_7 : i32 to vector<18x24x128xi32>
    %22 = arith.cmpi sle, %15, %21 : vector<18x24x128xi32>
    %23 = arith.andi %20, %22 : vector<18x24x128xi1>
    %c1_i32_8 = arith.constant 1 : i32
    %24 = vector.broadcast %c1_i32_8 : i32 to vector<18x24x128xi32>
    %25 = arith.cmpi sge, %18, %24 : vector<18x24x128xi32>
    %26 = arith.andi %23, %25 : vector<18x24x128xi1>
    %c16_i32_9 = arith.constant 16 : i32
    %27 = vector.broadcast %c16_i32_9 : i32 to vector<18x24x128xi32>
    %28 = arith.cmpi sle, %18, %27 : vector<18x24x128xi32>
    %29 = arith.andi %26, %28 : vector<18x24x128xi1>
    %cst_10 = arith.constant 0.000000e+00 : f32
    %30 = vector.broadcast %cst_10 : f32 to vector<18x24x128xf32>
    %31 = arith.select %29, %14, %30 : vector<18x24x128xi1>, vector<18x24x128xf32>
    %c0_11 = arith.constant 0 : index
    %c0_12 = arith.constant 0 : index
    %c0_13 = arith.constant 0 : index
    %32 = vector.load %arg10[%c0_11, %c0_12, %c0_13] : memref<18x24x128xf32, #tpu.memory_space<vmem>>, vector<18x24x128xf32>
    tpu.vector_store %arg10[%c0_11, %c0_12, %c0_13], %31 {strides = array<i32>} : memref<18x24x128xf32, #tpu.memory_space<vmem>>, vector<18x24x128xf32>,
    %c0_14 = arith.constant 0 : index
    %c0_15 = arith.constant 0 : index
    %c0_16 = arith.constant 0 : index
    %33 = vector.load %arg5[%c0_14, %c0_15, %c0_16] : memref<3x3x128xf32, #tpu.memory_space<vmem>>, vector<3x3x128xf32>
    %c0_17 = arith.constant 0 : index
    %c0_18 = arith.constant 0 : index
    %c0_19 = arith.constant 0 : index
    %34 = vector.load %arg10[%c0_17, %c0_18, %c0_19] : memref<18x24x128xf32, #tpu.memory_space<vmem>>, vector<16x16x128xf32>
    %35 = vector.extract_strided_slice %33 {offsets = [0, 0, 0], sizes = [1, 1, 128], strides = [1, 1, 1]} : vector<3x3x128xf32> to vector<1x1x128xf32>
    %36 = vector.shape_cast %35 : vector<1x1x128xf32> to vector<128xf32>
    %37 = vector.shape_cast %36 : vector<128xf32> to vector<1x1x128xf32>
    %38 = vector.broadcast %37 : vector<1x1x128xf32> to vector<16x16x128xf32>
    %39 = arith.mulf %34, %38 : vector<16x16x128xf32>
    %c0_20 = arith.constant 0 : index
    %c1 = arith.constant 1 : index
    %c0_21 = arith.constant 0 : index
    %40 = vector.load %arg10[%c0_20, %c1, %c0_21] : memref<18x24x128xf32, #tpu.memory_space<vmem>>, vector<16x16x128xf32>
    %41 = vector.extract_strided_slice %33 {offsets = [0, 1, 0], sizes = [1, 1, 128], strides = [1, 1, 1]} : vector<3x3x128xf32> to vector<1x1x128xf32>
    %42 = vector.shape_cast %41 : vector<1x1x128xf32> to vector<128xf32>
    %43 = vector.shape_cast %42 : vector<128xf32> to vector<1x1x128xf32>
    %44 = vector.broadcast %43 : vector<1x1x128xf32> to vector<16x16x128xf32>
    %45 = arith.mulf %40, %44 : vector<16x16x128xf32>
    %46 = arith.addf %39, %45 : vector<16x16x128xf32>
    %c0_22 = arith.constant 0 : index
    %c2 = arith.constant 2 : index
    %c0_23 = arith.constant 0 : index
    %47 = vector.load %arg10[%c0_22, %c2, %c0_23] : memref<18x24x128xf32, #tpu.memory_space<vmem>>, vector<16x16x128xf32>
    %48 = vector.extract_strided_slice %33 {offsets = [0, 2, 0], sizes = [1, 1, 128], strides = [1, 1, 1]} : vector<3x3x128xf32> to vector<1x1x128xf32>
    %49 = vector.shape_cast %48 : vector<1x1x128xf32> to vector<128xf32>
    %50 = vector.shape_cast %49 : vector<128xf32> to vector<1x1x128xf32>
    %51 = vector.broadcast %50 : vector<1x1x128xf32> to vector<16x16x128xf32>
    %52 = arith.mulf %47, %51 : vector<16x16x128xf32>
    %53 = arith.addf %46, %52 : vector<16x16x128xf32>
    %c1_24 = arith.constant 1 : index
    %c0_25 = arith.constant 0 : index
    %c0_26 = arith.constant 0 : index
    %54 = vector.load %arg10[%c1_24, %c0_25, %c0_26] : memref<18x24x128xf32, #tpu.memory_space<vmem>>, vector<16x16x128xf32>
    %55 = vector.extract_strided_slice %33 {offsets = [1, 0, 0], sizes = [1, 1, 128], strides = [1, 1, 1]} : vector<3x3x128xf32> to vector<1x1x128xf32>
    %56 = vector.shape_cast %55 : vector<1x1x128xf32> to vector<128xf32>
    %57 = vector.shape_cast %56 : vector<128xf32> to vector<1x1x128xf32>
    %58 = vector.broadcast %57 : vector<1x1x128xf32> to vector<16x16x128xf32>
    %59 = arith.mulf %54, %58 : vector<16x16x128xf32>
    %60 = arith.addf %53, %59 : vector<16x16x128xf32>
    %c1_27 = arith.constant 1 : index
    %c1_28 = arith.constant 1 : index
    %c0_29 = arith.constant 0 : index
    %61 = vector.load %arg10[%c1_27, %c1_28, %c0_29] : memref<18x24x128xf32, #tpu.memory_space<vmem>>, vector<16x16x128xf32>
    %62 = vector.extract_strided_slice %33 {offsets = [1, 1, 0], sizes = [1, 1, 128], strides = [1, 1, 1]} : vector<3x3x128xf32> to vector<1x1x128xf32>
    %63 = vector.shape_cast %62 : vector<1x1x128xf32> to vector<128xf32>
    %64 = vector.shape_cast %63 : vector<128xf32> to vector<1x1x128xf32>
    %65 = vector.broadcast %64 : vector<1x1x128xf32> to vector<16x16x128xf32>
    %66 = arith.mulf %61, %65 : vector<16x16x128xf32>
    %67 = arith.addf %60, %66 : vector<16x16x128xf32>
    %c1_30 = arith.constant 1 : index
    %c2_31 = arith.constant 2 : index
    %c0_32 = arith.constant 0 : index
    %68 = vector.load %arg10[%c1_30, %c2_31, %c0_32] : memref<18x24x128xf32, #tpu.memory_space<vmem>>, vector<16x16x128xf32>
    %69 = vector.extract_strided_slice %33 {offsets = [1, 2, 0], sizes = [1, 1, 128], strides = [1, 1, 1]} : vector<3x3x128xf32> to vector<1x1x128xf32>
    %70 = vector.shape_cast %69 : vector<1x1x128xf32> to vector<128xf32>
    %71 = vector.shape_cast %70 : vector<128xf32> to vector<1x1x128xf32>
    %72 = vector.broadcast %71 : vector<1x1x128xf32> to vector<16x16x128xf32>
    %73 = arith.mulf %68, %72 : vector<16x16x128xf32>
    %74 = arith.addf %67, %73 : vector<16x16x128xf32>
    %c2_33 = arith.constant 2 : index
    %c0_34 = arith.constant 0 : index
    %c0_35 = arith.constant 0 : index
    %75 = vector.load %arg10[%c2_33, %c0_34, %c0_35] : memref<18x24x128xf32, #tpu.memory_space<vmem>>, vector<16x16x128xf32>
    %76 = vector.extract_strided_slice %33 {offsets = [2, 0, 0], sizes = [1, 1, 128], strides = [1, 1, 1]} : vector<3x3x128xf32> to vector<1x1x128xf32>
    %77 = vector.shape_cast %76 : vector<1x1x128xf32> to vector<128xf32>
    %78 = vector.shape_cast %77 : vector<128xf32> to vector<1x1x128xf32>
    %79 = vector.broadcast %78 : vector<1x1x128xf32> to vector<16x16x128xf32>
    %80 = arith.mulf %75, %79 : vector<16x16x128xf32>
    %81 = arith.addf %74, %80 : vector<16x16x128xf32>
    %c2_36 = arith.constant 2 : index
    %c1_37 = arith.constant 1 : index
    %c0_38 = arith.constant 0 : index
    %82 = vector.load %arg10[%c2_36, %c1_37, %c0_38] : memref<18x24x128xf32, #tpu.memory_space<vmem>>, vector<16x16x128xf32>
    %83 = vector.extract_strided_slice %33 {offsets = [2, 1, 0], sizes = [1, 1, 128], strides = [1, 1, 1]} : vector<3x3x128xf32> to vector<1x1x128xf32>
    %84 = vector.shape_cast %83 : vector<1x1x128xf32> to vector<128xf32>
    %85 = vector.shape_cast %84 : vector<128xf32> to vector<1x1x128xf32>
    %86 = vector.broadcast %85 : vector<1x1x128xf32> to vector<16x16x128xf32>
    %87 = arith.mulf %82, %86 : vector<16x16x128xf32>
    %88 = arith.addf %81, %87 : vector<16x16x128xf32>
    %c2_39 = arith.constant 2 : index
    %c2_40 = arith.constant 2 : index
    %c0_41 = arith.constant 0 : index
    %89 = vector.load %arg10[%c2_39, %c2_40, %c0_41] : memref<18x24x128xf32, #tpu.memory_space<vmem>>, vector<16x16x128xf32>
    %90 = vector.extract_strided_slice %33 {offsets = [2, 2, 0], sizes = [1, 1, 128], strides = [1, 1, 1]} : vector<3x3x128xf32> to vector<1x1x128xf32>
    %91 = vector.shape_cast %90 : vector<1x1x128xf32> to vector<128xf32>
    %92 = vector.shape_cast %91 : vector<128xf32> to vector<1x1x128xf32>
    %93 = vector.broadcast %92 : vector<1x1x128xf32> to vector<16x16x128xf32>
    %94 = arith.mulf %89, %93 : vector<16x16x128xf32>
    %95 = arith.addf %88, %94 : vector<16x16x128xf32>
    %c0_42 = arith.constant 0 : index
    %c0_43 = arith.constant 0 : index
    %c0_44 = arith.constant 0 : index
    %96 = vector.load %arg6[%c0_42, %c0_43, %c0_44] : memref<1x1x128xf32, #tpu.memory_space<vmem>>, vector<1x1x128xf32>
    %97 = vector.broadcast %96 : vector<1x1x128xf32> to vector<16x16x128xf32>
    %98 = arith.addf %95, %97 : vector<16x16x128xf32>
    %cst_45 = arith.constant 0.000000e+00 : f32
    %99 = vector.broadcast %cst_45 : f32 to vector<16x16x128xf32>
    %100 = arith.maximumf %98, %99 : vector<16x16x128xf32>
    %101 = vector.shape_cast %100 : vector<16x16x128xf32> to vector<256x128xf32>
    %102 = arith.truncf %101 : vector<256x128xf32> to vector<256x128xbf16>
    %c0_46 = arith.constant 0 : index
    %c0_47 = arith.constant 0 : index
    %103 = vector.load %arg7[%c0_46, %c0_47] : memref<128x4xbf16, #tpu.memory_space<vmem>>, vector<128x4xbf16>
    %cst_48 = arith.constant dense<0.000000e+00> : vector<256x4xf32>
    %104 = tpu.matmul %102, %103, %cst_48 {dimension_numbers = #tpu.dot_dimension_numbers<[1], [0], [0], [1], [0, 0, 1, 1], [], []>} : vector<256x128xbf16>, vector<128x4xbf16>, vector<256x4xf32> -> vector<256x4xf32>
    %c0_49 = arith.constant 0 : index
    %c0_50 = arith.constant 0 : index
    %105 = vector.load %arg8[%c0_49, %c0_50] : memref<1x4xf32, #tpu.memory_space<vmem>>, vector<1x4xf32>
    %106 = vector.broadcast %105 : vector<1x4xf32> to vector<256x4xf32>
    %107 = arith.addf %104, %106 : vector<256x4xf32>
    %108 = vector.shape_cast %107 : vector<256x4xf32> to vector<1x16x16x4xf32>
    %c0_51 = arith.constant 0 : index
    %c0_52 = arith.constant 0 : index
    %c0_53 = arith.constant 0 : index
    %c0_54 = arith.constant 0 : index
    %109 = vector.load %arg9[%c0_51, %c0_52, %c0_53, %c0_54] : memref<1x16x16x4xf32, #tpu.memory_space<vmem>>, vector<1x16x16x4xf32>
    tpu.vector_store %arg9[%c0_51, %c0_52, %c0_53, %c0_54], %108 {strides = array<i32>} : memref<1x16x16x4xf32, #tpu.memory_space<vmem>>, vector<1x16x16x4xf32>,
    return
  }
  func.func @transform_0(%arg0: i32, %arg1: i32) -> (i32, i32, i32, i32) {
    %c0_i32 = arith.constant 0 : i32
    %c0_i32_0 = arith.constant 0 : i32
    %c0_i32_1 = arith.constant 0 : i32
    %c0_i32_2 = arith.constant 0 : i32
    return %arg0, %c0_i32, %c0_i32_0, %c0_i32_1 : i32, i32, i32, i32
  }
  func.func @transform_1(%arg0: i32, %arg1: i32) -> (i32, i32) {
    %c0_i32 = arith.constant 0 : i32
    %c0_i32_0 = arith.constant 0 : i32
    %c0_i32_1 = arith.constant 0 : i32
    return %c0_i32, %c0_i32_0 : i32, i32
  }
  func.func @transform_2(%arg0: i32, %arg1: i32) -> (i32, i32) {
    %c0_i32 = arith.constant 0 : i32
    %c0_i32_0 = arith.constant 0 : i32
    %c0_i32_1 = arith.constant 0 : i32
    return %c0_i32, %c0_i32_0 : i32, i32
  }
  func.func @transform_3(%arg0: i32, %arg1: i32) -> (i32, i32, i32) {
    %c0_i32 = arith.constant 0 : i32
    %c0_i32_0 = arith.constant 0 : i32
    %c0_i32_1 = arith.constant 0 : i32
    %c0_i32_2 = arith.constant 0 : i32
    return %c0_i32, %c0_i32_0, %c0_i32_1 : i32, i32, i32
  }
  func.func @transform_4(%arg0: i32, %arg1: i32) -> (i32, i32, i32) {
    %c0_i32 = arith.constant 0 : i32
    %c0_i32_0 = arith.constant 0 : i32
    %c0_i32_1 = arith.constant 0 : i32
    %c0_i32_2 = arith.constant 0 : i32
    return %c0_i32, %c0_i32_0, %c0_i32_1 : i32, i32, i32
  }
  func.func @transform_5(%arg0: i32, %arg1: i32) -> (i32, i32) {
    %c0_i32 = arith.constant 0 : i32
    %c0_i32_0 = arith.constant 0 : i32
    %c0_i32_1 = arith.constant 0 : i32
    return %c0_i32, %c0_i32_0 : i32, i32
  }
  func.func @transform_6(%arg0: i32, %arg1: i32) -> (i32, i32) {
    %c0_i32 = arith.constant 0 : i32
    %c0_i32_0 = arith.constant 0 : i32
    %c0_i32_1 = arith.constant 0 : i32
    return %c0_i32, %c0_i32_0 : i32, i32
  }
  func.func @transform_7(%arg0: i32, %arg1: i32) -> (i32, i32, i32, i32) {
    %c0_i32 = arith.constant 0 : i32
    %c0_i32_0 = arith.constant 0 : i32
    %c0_i32_1 = arith.constant 0 : i32
    return %arg0, %arg1, %c0_i32, %c0_i32_0 : i32, i32, i32, i32
  }
}

</mosaic_0001>

<bundles_post_ra>
// kernel: inverted_residual_forward.1
= control target key start
LH: loop header
LB: loop body
LE: loop exit
PB: predicated region body
PF: predicated region fallthrough
CT: control target
= control target key end

     0   :  { %s2354_s24 = smov 0   ;;  %s2356_s25 = smov 0   ;;  %s3471_s0 = inlined_call_operand.vmem [shape: f32[2,18,24,4], index: 0, kind: input, shape index: {}]   ;;  %s3472_s1 = inlined_call_operand.vmem [shape: bf16[4,128], index: 1, kind: input, shape index: {}]   ;;  %s3473_s2 = inlined_call_operand.vmem [shape: f32[1,128], index: 2, kind: input, shape index: {}]   ;;  %s3474_s3 = inlined_call_operand.vmem [shape: f32[3,3,128], index: 3, kind: input, shape index: {}]   ;;  %s3475_s4 = inlined_call_operand.vmem [shape: f32[1,1,128], index: 4, kind: input, shape index: {}]   ;;  %s3476_s5 = inlined_call_operand.vmem [shape: bf16[128,4], index: 5, kind: input, shape index: {}]   ;;  %s3477_s6 = inlined_call_operand.vmem [shape: f32[1,4], index: 6, kind: input, shape index: {}]   ;;  %s3478_s7 = inlined_call_operand.vmem [shape: f32[2,16,16,4], index: 7, kind: output, shape index: {}]  }
   0x1   :  { %s2358_s26 = smov 0  }
   0x2 LB: > { %s29_s27 = sadd.s32 1, %s2307_s25  ;;  %p2173_p0 = scmp.ge.s32.totalorder %s2311_s26, 1  ;;  %s2311_s26 = sphi %s2358_s26, %s17_s26   ;;  %s2307_s25 = sphi %s2356_s25, %s3494_s25   ;;  %s2303_s24 = sphi %s2354_s24, %s3493_s24  }
   0x3   : > { %p31_p1 = scmp.ge.s32.totalorder %s29_s27, 2  ;;  %p251_p2 = scmp.lt.s32.totalorder %s2311_s26, 3 }
   0x5   : > { %s3496_s27 = smov (%p31_p1, %s29_s27), 0  ;;  %p252_p3 = pnand %p2173_p0, %p251_p2 }
   0x7   : > { %255 = sbr.rel (%p252_p3) target bundleno = 557 (0x22d), region = 48 }
   0xc   : > { %v389_v0 = vld [vmem:[%s3472_s1] sm:$0x3]  ;;  %vm476_vm0 = vcmask 1041408   ;;  %p288_p4 = scmp.lt.s32.totalorder %s2303_s24, 1  ;;  %vm394_vm1 = vcmask 31744   ;;  %v2313_v50 = vmov 0.0   ;;  %v678_v58 = vlaneseq }
   0xd   : > { %v478_v1 = vsel %vm476_vm0, %v389_v0, 0  ;;  %907 = vst [vmem:[#allocation2] sm:$0xff] %v2313_v50  ;;  %v2440_v59 = vld [vmem:[%s3473_s2] ss:$0 sm:$0xff] }
   0xe   : > { %487 = vmatpush.bf16.msra.mxu0 %v478_v1  ;;  %2247 = vmatpush.bf16.msra.mxu2 %v478_v1  ;;  %s3498_s24 = smov (!%p288_p4, %s2303_s24), 1  ;;  %908 = vst [vmem:[#allocation2 + $0x8] sm:$0xff] %v2313_v50  ;;  %v2442_v61 = vshrl.u32 %v678_v58, 7 }
   0xf   : > { %2248 = vmatpush.bf16.msra.mxu3 %v478_v1  ;;  %s2257_s30 = smul.u32 432, %s3498_s24  ;;  %909 = vst [vmem:[#allocation2 + $0x10] sm:$0xff] %v2313_v50  ;;  %s2238_s22 = sshll.u32 %s3498_s24, 8 }
  0x10   : > { %958 = vst [vmem:[#allocation2 + $0x198] sm:$0xff] %v2313_v50  ;;  %vm700_vm2 = vcmp.ge.s32.totalorder %v2442_v61, 1 }
  0x11   : > { %s2381_s10 = scalar_lea.vmem %s3471_s0, %s2257_s30  ;;  %959 = vst [vmem:[#allocation2 + $0x1a0] sm:$0xff] %v2313_v50  ;;  %s3269_s30 = scalar_lea.vmem %s3478_s7, %s2238_s22 }
  0x12   : > { %v308_v2 = vld [vmem:[%s2381_s10] sm:$0xff]  ;;  %v309_v3 = vld [vmem:[%s2381_s10 + $0x8] sm:$0xff]  ;;  %v310_v8 = vld [vmem:[%s2381_s10 + $0x10] sm:$0xff]  ;;  %960 = vst [vmem:[#allocation2 + $0x1a8] sm:$0xff] %v2313_v50 }
  0x13   : > { %v332_v4 = vld [vmem:[%s2381_s10 + $0xc0] sm:$0xff]  ;;  %v362_v5 = vpack.c.bf16 %v309_v3, %v308_v2  ;;  %v333_v6 = vld [vmem:[%s2381_s10 + $0xc8] sm:$0xff]  ;;  %v311_v9 = vld [vmem:[%s2381_s10 + $0x18] sm:$0xff] }
  0x14   : > { %v374_v7 = vpack.c.bf16 %v333_v6, %v332_v4  ;;  %v334_v10 = vld [vmem:[%s2381_s10 + $0xd0] sm:$0xff]  ;;  %v335_v11 = vld [vmem:[%s2381_s10 + $0xd8] sm:$0xff]  ;;  %v363_v12 = vpack.c.bf16 %v311_v9, %v310_v8  ;;  %v312_v14 = vld [vmem:[%s2381_s10 + $0x20] sm:$0xff] }
  0x15   : > { %2177 = vmatmul.msk.bf16.vlgmr.msra.gmra.mxu0 %vm394_vm1, %v362_v5  ;;  %v375_v13 = vpack.c.bf16 %v335_v11, %v334_v10  ;;  %v313_v15 = vld [vmem:[%s2381_s10 + $0x28] sm:$0xff]  ;;  %v336_v16 = vld [vmem:[%s2381_s10 + $0xe0] sm:$0xff]  ;;  %v314_v20 = vld [vmem:[%s2381_s10 + $0x30] sm:$0xff] }
  0x16   : > { %2189 = vmatmul.msk.bf16.vlgmr.msra.gmra.mxu2 %vm394_vm1, %v374_v7  ;;  %v337_v17 = vld [vmem:[%s2381_s10 + $0xe8] sm:$0xff]  ;;  %v364_v18 = vpack.c.bf16 %v313_v15, %v312_v14  ;;  %v315_v21 = vld [vmem:[%s2381_s10 + $0x38] sm:$0xff]  ;;  %v338_v22 = vld [vmem:[%s2381_s10 + $0xf0] sm:$0xff]  ;;  %v2459_v15 = vadd.s32 16, %v2442_v61 }
  0x17   : > { %v376_v19 = vpack.c.bf16 %v337_v17, %v336_v16  ;;  %v339_v23 = vld [vmem:[%s2381_s10 + $0xf8] sm:$0xff]  ;;  %v365_v24 = vpack.c.bf16 %v315_v21, %v314_v20  ;;  %v316_v26 = vld [vmem:[%s2381_s10 + $0x40] sm:$0xff]  ;;  %v317_v27 = vld [vmem:[%s2381_s10 + $0x48] sm:$0xff] }
  0x18   : > { %v377_v25 = vpack.c.bf16 %v339_v23, %v338_v22  ;;  %v340_v28 = vld [vmem:[%s2381_s10 + $0x100] sm:$0xff]  ;;  %v341_v29 = vld [vmem:[%s2381_s10 + $0x108] sm:$0xff]  ;;  %v366_v30 = vpack.c.bf16 %v317_v27, %v316_v26  ;;  %v318_v32 = vld [vmem:[%s2381_s10 + $0x50] sm:$0xff]  ;;  %vm705_vm3 = vcmp.le.s32.totalorder %v2459_v15, 16 }
  0x19   : > { %v378_v31 = vpack.c.bf16 %v341_v29, %v340_v28  ;;  %v319_v33 = vld [vmem:[%s2381_s10 + $0x58] sm:$0xff]  ;;  %v342_v34 = vld [vmem:[%s2381_s10 + $0x110] sm:$0xff]  ;;  %v320_v38 = vld [vmem:[%s2381_s10 + $0x60] sm:$0xff] }
  0x1a   : > { %v343_v35 = vld [vmem:[%s2381_s10 + $0x118] sm:$0xff]  ;;  %v367_v36 = vpack.c.bf16 %v319_v33, %v318_v32  ;;  %v321_v39 = vld [vmem:[%s2381_s10 + $0x68] sm:$0xff]  ;;  %v344_v40 = vld [vmem:[%s2381_s10 + $0x120] sm:$0xff] }
  0x1b   : > { %v379_v37 = vpack.c.bf16 %v343_v35, %v342_v34  ;;  %v345_v41 = vld [vmem:[%s2381_s10 + $0x128] sm:$0xff]  ;;  %v368_v42 = vpack.c.bf16 %v321_v39, %v320_v38  ;;  %v322_v44 = vld [vmem:[%s2381_s10 + $0x70] sm:$0xff]  ;;  %v323_v45 = vld [vmem:[%s2381_s10 + $0x78] sm:$0xff] }
  0x1c   : > { %v380_v43 = vpack.c.bf16 %v345_v41, %v344_v40  ;;  %v346_v46 = vld [vmem:[%s2381_s10 + $0x130] sm:$0xff]  ;;  %v347_v47 = vld [vmem:[%s2381_s10 + $0x138] sm:$0xff]  ;;  %v369_v48 = vpack.c.bf16 %v323_v45, %v322_v44  ;;  %v324_v51 = vld [vmem:[%s2381_s10 + $0x80] sm:$0xff] }
  0x1d   : > { %v381_v49 = vpack.c.bf16 %v347_v47, %v346_v46  ;;  %v325_v52 = vld [vmem:[%s2381_s10 + $0x88] sm:$0xff]  ;;  %v348_v53 = vld [vmem:[%s2381_s10 + $0x140] sm:$0xff]  ;;  %v326_v2 = vld [vmem:[%s2381_s10 + $0x90] sm:$0xff] }
  0x1e   : > { %v349_v54 = vld [vmem:[%s2381_s10 + $0x148] sm:$0xff]  ;;  %v370_v55 = vpack.c.bf16 %v325_v52, %v324_v51  ;;  %v327_v3 = vld [vmem:[%s2381_s10 + $0x98] sm:$0xff]  ;;  %v350_v4 = vld [vmem:[%s2381_s10 + $0x150] sm:$0xff] }
  0x1f   : > { %v382_v57 = vpack.c.bf16 %v349_v54, %v348_v53  ;;  %v351_v5 = vld [vmem:[%s2381_s10 + $0x158] sm:$0xff]  ;;  %v371_v7 = vpack.c.bf16 %v327_v3, %v326_v2  ;;  %v356_v8 = vld [vmem:[%s2381_s10 + $0x180] sm:$0xff]  ;;  %v357_v9 = vld [vmem:[%s2381_s10 + $0x188] sm:$0xff] }
  0x20   : > { %v2246_v21 = vld [vmem:[%s3476_s5 + $0x38] sm:$0xff]  ;;  %v352_v27 = vld [vmem:[%s2381_s10 + $0x160] sm:$0xff]  ;;  %v353_v28 = vld [vmem:[%s2381_s10 + $0x168] sm:$0xff] }
  0x21   : > { %1959 = vmatpush.bf16.msra.mxu1 %v2246_v21  ;;  %2249 = vmatpush.bf16.msrb.mxu3 %v2246_v21  ;;  %v2245_v29 = vld [vmem:[%s3476_s5 + $0x30] sm:$0xff]  ;;  %v359_v33 = vld [vmem:[%s2381_s10 + $0x198] sm:$0xff]  ;;  %v2244_v40 = vld [vmem:[%s3476_s5 + $0x28] sm:$0xff] }
  0x22   : > { %v358_v32 = vld [vmem:[%s2381_s10 + $0x190] sm:$0xff]  ;;  %v331_v52 = vld [vmem:[%s2381_s10 + $0xb8] sm:$0xff]  ;;  %v3136_v61 = vld [vmem:[%s3475_s4] ss:$0 sm:$0xff] }
  0x23   : > { %v330_v51 = vld [vmem:[%s2381_s10 + $0xb0] sm:$0xff] }
  0x24   : > { %v354_v54 = vld [vmem:[%s2381_s10 + $0x170] sm:$0xff] }
  0x25   : > { %2178 = vmatmul.msk.bf16.gmra.mxu0 %vm394_vm1, %v363_v12  ;;  %v383_v12 = vpack.c.bf16 %v351_v5, %v350_v4  ;;  %1960 = vmatpush.bf16.msra.mxu1 %v2245_v29  ;;  %v1029_v4 = vld [vmem:[#allocation2 + $0x1] sm:$0xff] }
  0x26   : > { %2190 = vmatmul.msk.bf16.gmra.mxu2 %vm394_vm1, %v375_v13  ;;  %v386_v13 = vpack.c.bf16 %v357_v9, %v356_v8  ;;  %2250 = vmatpush.bf16.msrb.mxu3 %v2245_v29  ;;  %v1127_v29 = vld [vmem:[#allocation2 + $0xa] sm:$0xff] }
  0x28   : > { %2201 = vmatmul.msk.bf16.vlgmr.msra.gmra.mxu3 %vm394_vm1, %v386_v13  ;;  %v962_v13 = vld [vmem:[%s3474_s3 + $0x4] sm:$0x7] }
  0x29   : > { %1961 = vmatpush.bf16.msra.mxu1 %v2244_v40 }
  0x2a   : > { %2251 = vmatpush.bf16.msrb.mxu3 %v2244_v40 }
  0x35   : > { %2179 = vmatmul.msk.bf16.gmra.mxu0 %vm394_vm1, %v364_v18 }
  0x36   : > { %2191 = vmatmul.msk.bf16.gmra.mxu2 %vm394_vm1, %v376_v19 }
  0x45   : > { %2180 = vmatmul.msk.bf16.gmra.mxu0 %vm394_vm1, %v365_v24  ;;  %v328_v24 = vld [vmem:[%s2381_s10 + $0xa0] sm:$0xff] }
  0x46   : > { %2192 = vmatmul.msk.bf16.gmra.mxu2 %vm394_vm1, %v377_v25  ;;  %v329_v25 = vld [vmem:[%s2381_s10 + $0xa8] sm:$0xff] }
  0x55   : > { %2181 = vmatmul.msk.bf16.gmra.mxu0 %vm394_vm1, %v366_v30 }
  0x56   : > { %2193 = vmatmul.msk.bf16.gmra.mxu2 %vm394_vm1, %v378_v31  ;;  %v372_v31 = vpack.c.bf16 %v329_v25, %v328_v24 }
  0x65   : > { %2182 = vmatmul.msk.bf16.gmra.mxu0 %vm394_vm1, %v367_v36  ;;  %v384_v36 = vpack.c.bf16 %v353_v28, %v352_v27 }
  0x66   : > { %2194 = vmatmul.msk.bf16.gmra.mxu2 %vm394_vm1, %v379_v37  ;;  %v387_v37 = vpack.c.bf16 %v359_v33, %v358_v32 }
  0x68   : > { %2202 = vmatmul.msk.bf16.gmra.mxu3 %vm394_vm1, %v387_v37 }
  0x75   : > { %2183 = vmatmul.msk.bf16.gmra.mxu0 %vm394_vm1, %v368_v42 }
  0x76   : > { %2195 = vmatmul.msk.bf16.gmra.mxu2 %vm394_vm1, %v380_v43  ;;  %v2243_v43 = vld [vmem:[%s3476_s5 + $0x20] sm:$0xff] }
  0x77   : > { %1962 = vmatpush.bf16.msra.mxu1 %v2243_v43  ;;  %2252 = vmatpush.bf16.msrb.mxu3 %v2243_v43 }
  0x85   : > { %2184 = vmatmul.msk.bf16.gmra.mxu0 %vm394_vm1, %v369_v48 }
  0x86   : > { %2196 = vmatmul.msk.bf16.gmra.mxu2 %vm394_vm1, %v381_v49  ;;  %v2242_v49 = vld [vmem:[%s3476_s5 + $0x18] sm:$0xff] }
  0x87   : > { %1963 = vmatpush.bf16.msra.mxu1 %v2242_v49  ;;  %2253 = vmatpush.bf16.msrb.mxu3 %v2242_v49 }
  0x92   : > { %v489_v56 = vpop.f32.mrf.mxu0 }
  0x93   : > { %v961_v56 = vld [vmem:[%s3474_s3] sm:$0x7] }
  0x94   : > { %v2519_v2 = vperm.slane %v961_v56, 1 }
  0x95   : > { %2185 = vmatmul.msk.bf16.gmra.mxu0 %vm394_vm1, %v370_v55  ;;  %v355_v55 = vld [vmem:[%s2381_s10 + $0x178] sm:$0xff] }
  0x96   : > { %2197 = vmatmul.msk.bf16.gmra.mxu2 %vm394_vm1, %v382_v57  ;;  %v2241_v57 = vld [vmem:[%s3476_s5 + $0x10] sm:$0xff] }
  0x97   : > { %1964 = vmatpush.bf16.msra.mxu1 %v2241_v57  ;;  %2254 = vmatpush.bf16.msrb.mxu3 %v2241_v57 }
  0x99   : > { %v549_v60 = vpop.f32.mrf.mxu2 }
  0x9a   : > { %v550_v62 = vadd.f32 %v2440_v59, %v549_v60  ;;  %v491_v63 = vpop.f32.mrf.mxu0  ;;  %v373_v60 = vpack.c.bf16 %v331_v52, %v330_v51 }
  0x9c   : > { %v648_v0 = vmax.f32 %v550_v62, 0.0 }
  0x9e   : > { %v877_v1 = vsel %vm700_vm2, %v648_v0, 0.0  ;;  %v385_v0 = vpack.c.bf16 %v355_v55, %v354_v54 }
  0x9f   : > { %931 = vst [vmem:[#allocation2 + $0xc0] sm:$0xff] %v877_v1  ;;  %v2517_v1 = vperm.slane %v961_v56, 0 }
  0xa1   : > { %v551_v6 = vpop.f32.mrf.mxu2  ;;  %v997_v9 = vmul.f32 0.0, %v2517_v1 }
  0xa2   : > { %v552_v10 = vadd.f32 %v2440_v59, %v551_v6  ;;  %v494_v11 = vpop.f32.mrf.mxu0  ;;  %v2240_v6 = vld [vmem:[%s3476_s5 + $0x8] sm:$0xff] }
  0xa3   : > { %1965 = vmatpush.bf16.msra.mxu1 %v2240_v6  ;;  %v2531_v11 = vperm.slane %v961_v56, 2  ;;  %2255 = vmatpush.bf16.msrb.mxu3 %v2240_v6 }
  0xa4   : > { %v649_v14 = vmax.f32 %v552_v10, 0.0  ;;  %v1062_v10 = vmul.f32 %v2519_v2, %v1029_v4 }
  0xa5   : > { %2186 = vmatmul.msk.bf16.gmra.mxu0 %vm394_vm1, %v371_v7  ;;  %v1160_v37 = vmul.f32 %v2531_v11, %v1127_v29 }
  0xa6   : > { %932 = vst [vmem:[#allocation2 + $0xc8] sm:$0xff] %v649_v14  ;;  %2198 = vmatmul.msk.bf16.gmra.mxu2 %vm394_vm1, %v383_v12  ;;  %v1126_v14 = vld [vmem:[#allocation2 + $0x2] sm:$0xff]  ;;  %v1094_v21 = vadd.f32 %v1062_v10, %v997_v9 }
  0xa9   : > { %v554_v16 = vpop.f32.mrf.mxu2 }
  0xaa   : > { %v555_v17 = vadd.f32 %v2440_v59, %v554_v16  ;;  %v496_v18 = vpop.f32.mrf.mxu0  ;;  %v2239_v16 = vld [vmem:[%s3476_s5] sm:$0xff] }
  0xab   : > { %v497_v19 = vadd.f32 %v2440_v59, %v496_v18  ;;  %v1030_v18 = vld [vmem:[#allocation2 + $0x9] sm:$0xff]  ;;  %1966 = vmatpush.bf16.msra.mxu1 %v2239_v16  ;;  %2256 = vmatpush.bf16.msrb.mxu3 %v2239_v16 }
  0xac   : > { %v650_v20 = vmax.f32 %v555_v17, 0.0  ;;  %v1063_v27 = vmul.f32 %v2519_v2, %v1030_v18 }
  0xad   : > { %v627_v22 = vmax.f32 %v497_v19, 0.0 }
  0xae   : > { %v879_v23 = vsel %vm705_vm3, %v650_v20, 0.0 }
  0xaf   : > { %933 = vst [vmem:[#allocation2 + $0xd0] sm:$0xff] %v879_v23  ;;  %v2473_v26 = vsel %vm700_vm2, %v627_v22, 0.0  ;;  %v1159_v22 = vmul.f32 %v2531_v11, %v1126_v14  ;;  %v2546_v23 = vperm.slane %v962_v13, 0 }
  0xb0   : > { %910 = vst [vmem:[#allocation2 + $0x18] sm:$0xff] %v2473_v26 }
  0xb1   : > { %v556_v30 = vpop.f32.mrf.mxu2  ;;  %v1191_v32 = vadd.f32 %v1159_v22, %v1094_v21  ;;  %v1257_v33 = vmul.f32 %v2546_v23, %v2473_v26 }
  0xb2   : > { %v557_v34 = vadd.f32 %v2440_v59, %v556_v30  ;;  %v499_v35 = vpop.f32.mrf.mxu0 }
  0xb3   : > { %v500_v38 = vadd.f32 %v2440_v59, %v499_v35  ;;  %v963_v35 = vld [vmem:[%s3474_s3 + $0x8] sm:$0x7]  ;;  %v1289_v43 = vadd.f32 %v1257_v33, %v1191_v32 }
  0xb4   : > { %v651_v39 = vmax.f32 %v557_v34, 0.0  ;;  %v2560_v34 = vperm.slane %v962_v13, 1  ;;  %v2593_v57 = vperm.slane %v963_v35, 1 }
  0xb5   : > { %v2489_v41 = vmax.f32 %v500_v38, 0.0  ;;  %2187 = vmatmul.msk.bf16.gmra.mxu0 %vm394_vm1, %v372_v31 }
  0xb6   : > { %v880_v42 = vsel %vm700_vm2, %v651_v39, 0.0  ;;  %2199 = vmatmul.msk.bf16.gmra.mxu2 %vm394_vm1, %v384_v36  ;;  %v1095_v36 = vadd.f32 %v1063_v27, %v997_v9 }
  0xb7   : > { %934 = vst [vmem:[#allocation2 + $0xd8] sm:$0xff] %v880_v42  ;;  %v1258_v51 = vmul.f32 %v2546_v23, %v2489_v41 }
  0xb8   : > { %911 = vst [vmem:[#allocation2 + $0x20] sm:$0xff] %v2489_v41 }
  0xb9   : > { %v559_v44 = vpop.f32.mrf.mxu2 }
  0xba   : > { %v560_v45 = vadd.f32 %v2440_v59, %v559_v44  ;;  %v501_v46 = vpop.f32.mrf.mxu0 }
  0xbb   : > { %v502_v47 = vadd.f32 %v2440_v59, %v501_v46 }
  0xbc   : > { %v652_v48 = vmax.f32 %v560_v45, 0.0 }
  0xbd   : > { %v629_v50 = vmax.f32 %v502_v47, 0.0  ;;  %v2578_v47 = vperm.slane %v962_v13, 2  ;;  %v2607_v13 = vperm.slane %v963_v35, 2 }
  0xbe   : > { %935 = vst [vmem:[#allocation2 + $0xe0] sm:$0xff] %v652_v48  ;;  %v2580_v48 = vperm.slane %v963_v35, 0 }
  0xbf   : > { %v858_v53 = vsel %vm705_vm3, %v629_v50, 0.0  ;;  %v2552_v30 = vld [vmem:[#allocation2 + $0x19] sm:$0xff]  ;;  %v1192_v50 = vadd.f32 %v1160_v37, %v1095_v36 }
  0xc0   : > { %912 = vst [vmem:[#allocation2 + $0x28] sm:$0xff] %v858_v53  ;;  %v1354_v38 = vmul.f32 %v2560_v34, %v2552_v30  ;;  %v2576_v46 = vld [vmem:[#allocation2 + $0x1a] sm:$0xff] }
  0xc1   : > { %v561_v58 = vpop.f32.mrf.mxu2  ;;  %v1451_v55 = vmul.f32 %v2578_v47, %v2576_v46  ;;  %v2631_v37 = vld [vmem:[%s3475_s4] ss:$0 sm:$0xff] }
  0xc2   : > { %v562_v62 = vadd.f32 %v2440_v59, %v561_v58  ;;  %v504_v63 = vpop.f32.mrf.mxu0  ;;  %v1386_v52 = vadd.f32 %v1354_v38, %v1289_v43  ;;  %v1064_v38 = vmul.f32 %v2552_v30, %v2519_v2 }
  0xc3   : > { %v505_v3 = vadd.f32 %v2440_v59, %v504_v63 }
  0xc4   : > { %v653_v5 = vmax.f32 %v562_v62, 0.0  ;;  %v1290_v62 = vadd.f32 %v1258_v51, %v1192_v50  ;;  %v1483_v63 = vadd.f32 %v1451_v55, %v1386_v52 }
  0xc5   : > { %v630_v7 = vmax.f32 %v505_v3, 0.0  ;;  %2188 = vmatmul.msk.bf16.gmra.mxu0 %vm394_vm1, %v373_v60 }
  0xc6   : > { %v882_v8 = vsel %vm705_vm3, %v653_v5, 0.0  ;;  %2200 = vmatmul.msk.bf16.gmra.mxu2 %vm394_vm1, %v385_v0 }
  0xc7   : > { %936 = vst [vmem:[#allocation2 + $0xe8] sm:$0xff] %v882_v8  ;;  %v2535_v12 = vsel %vm700_vm2, %v630_v7, 0.0  ;;  %v2574_v45 = vld [vmem:[#allocation2 + $0x21] sm:$0xff] }
  0xc8   : > { %913 = vst [vmem:[#allocation2 + $0x30] sm:$0xff] %v2535_v12  ;;  %v1355_v54 = vmul.f32 %v2560_v34, %v2574_v45  ;;  %v1549_v56 = vmul.f32 %v2580_v48, %v2535_v12  ;;  %v2601_v4 = vld [vmem:[#allocation2 + $0x22] sm:$0xff] }
  0xc9   : > { %v564_v17 = vpop.f32.mrf.mxu2  ;;  %v1452_v16 = vmul.f32 %v2578_v47, %v2601_v4 }
  0xca   : > { %v565_v19 = vadd.f32 %v2440_v59, %v564_v17  ;;  %v506_v20 = vpop.f32.mrf.mxu0  ;;  %v1387_v7 = vadd.f32 %v1355_v54, %v1290_v62  ;;  %v1581_v8 = vadd.f32 %v1549_v56, %v1483_v63  ;;  %v999_v56 = vmul.f32 %v2517_v1, %v2473_v26 }
  0xcb   : > { %v507_v24 = vadd.f32 %v2440_v59, %v506_v20  ;;  %v1161_v26 = vmul.f32 %v2576_v46, %v2531_v11  ;;  %v1000_v46 = vmul.f32 %v2517_v1, %v2489_v41 }
  0xcc   : > { %v654_v25 = vmax.f32 %v565_v19, 0.0  ;;  %v1484_v21 = vadd.f32 %v1452_v16, %v1387_v7  ;;  %v1096_v7 = vadd.f32 %v1064_v38, %v999_v56 }
  0xcd   : > { %v2550_v28 = vmax.f32 %v507_v24, 0.0  ;;  %v1528_v24 = vld [vmem:[#allocation2 + $0xc0] sm:$0xff] }
  0xce   : > { %v2556_v31 = vsel %vm700_vm2, %v654_v25, 0.0  ;;  %v1625_v25 = vld [vmem:[#allocation2 + $0xc1] sm:$0xff]  ;;  %v1013_v51 = vmul.f32 %v1528_v24, %v2517_v1 }
  0xcf   : > { %937 = vst [vmem:[#allocation2 + $0xf0] sm:$0xff] %v2556_v31  ;;  %v1550_v17 = vmul.f32 %v2580_v48, %v2550_v28  ;;  %v1078_v52 = vmul.f32 %v1625_v25, %v2519_v2  ;;  %v2650_v62 = vmul.f32 %v2593_v57, %v1625_v25 }
  0xd0   : > { %914 = vst [vmem:[#allocation2 + $0x38] sm:$0xff] %v2550_v28 }
  0xd1   : > { %v566_v39 = vpop.f32.mrf.mxu2  ;;  %v1582_v33 = vadd.f32 %v1550_v17, %v1484_v21 }
  0xd2   : > { %v2571_v40 = vadd.f32 %v2440_v59, %v566_v39  ;;  %v509_v42 = vpop.f32.mrf.mxu0  ;;  %v1529_v39 = vld [vmem:[#allocation2 + $0xc8] sm:$0xff] }
  0xd3   : > { %v510_v44 = vadd.f32 %v2440_v59, %v509_v42  ;;  %v1722_v42 = vld [vmem:[#allocation2 + $0xc2] sm:$0xff]  ;;  %v2639_v50 = vmul.f32 %v2580_v48, %v1529_v39  ;;  %v2677_v21 = vmul.f32 %v1529_v39, %v2546_v23 }
  0xd4   : > { %v655_v49 = vmax.f32 %v2571_v40, 0.0  ;;  %v2653_v63 = vmul.f32 %v2607_v13, %v1722_v42 }
  0xd5   : > { %v632_v53 = vmax.f32 %v510_v44, 0.0  ;;  %v2636_v44 = vmul.f32 %v2580_v48, %v1528_v24 }
  0xd6   : > { %938 = vst [vmem:[#allocation2 + $0xf8] sm:$0xff] %v655_v49 }
  0xd7   : > { %v861_v58 = vsel %vm705_vm3, %v632_v53, 0.0  ;;  %v2597_v60 = vld [vmem:[#allocation2 + $0x31] sm:$0xff]  ;;  %3479 = vst [vmem:[#allocation3_spill] sm:$0xff] %v2653_v63 }
  0xd8   : > { %915 = vst [vmem:[#allocation2 + $0x40] sm:$0xff] %v861_v58  ;;  %v1646_v0 = vmul.f32 %v2593_v57, %v2597_v60  ;;  %v2605_v10 = vld [vmem:[#allocation2 + $0x32] sm:$0xff]  ;;  %v1356_v38 = vmul.f32 %v2597_v60, %v2560_v34 }
  0xd9   : > { %v569_v3 = vpop.f32.mrf.mxu2  ;;  %v1743_v22 = vmul.f32 %v2607_v13, %v2605_v10 }
  0xda   : > { %v570_v5 = vadd.f32 %v2440_v59, %v569_v3  ;;  %v511_v6 = vpop.f32.mrf.mxu0  ;;  %v1678_v18 = vadd.f32 %v1646_v0, %v1581_v8  ;;  %v2656_v0 = vmul.f32 %v1529_v39, %v2517_v1 }
  0xdb   : > { %v512_v9 = vadd.f32 %v2440_v59, %v511_v6 }
  0xdc   : > { %v656_v14 = vmax.f32 %v570_v5, 0.0  ;;  %v1775_v36 = vadd.f32 %v1743_v22, %v1678_v18  ;;  %v1065_v18 = vmul.f32 %v2574_v45, %v2519_v2  ;;  %v2680_v22 = vmul.f32 %v1625_v25, %v2560_v34 }
  0xdd   : > { %v633_v19 = vmax.f32 %v512_v9, 0.0  ;;  %v1110_v9 = vadd.f32 %v1078_v52, %v1013_v51  ;;  %v2695_v25 = vmul.f32 %v1528_v24, %v2546_v23 }
  0xde   : > { %v885_v20 = vsel %vm705_vm3, %v656_v14, 0.0  ;;  %v1811_v6 = vadd.f32 %v2631_v37, %v1775_v36  ;;  %v1175_v14 = vmul.f32 %v1722_v42, %v2531_v11  ;;  %3480 = vst [vmem:[#allocation4_spill] sm:$0xff] %v2680_v22  ;;  %v1193_v36 = vadd.f32 %v1161_v26, %v1096_v7 }
  0xdf   : > { %939 = vst [vmem:[#allocation2 + $0x100] sm:$0xff] %v885_v20  ;;  %v2619_v27 = vsel %vm700_vm2, %v633_v19, 0.0  ;;  %v2621_v29 = vld [vmem:[#allocation2 + $0x39] sm:$0xff]  ;;  %v1259_v19 = vmul.f32 %v2546_v23, %v2535_v12  ;;  %v1723_v20 = vld [vmem:[#allocation2 + $0xca] sm:$0xff]  ;;  %v1260_v7 = vmul.f32 %v2546_v23, %v2550_v28 }
  0xe0   : > { %v2623_v32 = vld [vmem:[#allocation2 + $0x3a] sm:$0xff]  ;;  %916 = vst [vmem:[#allocation2 + $0x48] sm:$0xff] %v2619_v27  ;;  %v1647_v35 = vmul.f32 %v2593_v57, %v2621_v29  ;;  %v1843_v45 = vmax.f32 %v1811_v6, 0.0  ;;  %v2692_v39 = vmul.f32 %v2607_v13, %v1723_v20  ;;  %v1162_v6 = vmul.f32 %v2601_v4, %v2531_v11 }
  0xe1   : > { %v571_v43 = vpop.f32.mrf.mxu2  ;;  %v1744_v30 = vmul.f32 %v2607_v13, %v2623_v32 }
  0xe2   : > { %v572_v53 = vadd.f32 %v2440_v59, %v571_v43  ;;  %v514_v54 = vpop.f32.mrf.mxu0  ;;  %v1679_v55 = vadd.f32 %v1647_v35, %v1582_v33  ;;  %v2683_v33 = vmul.f32 %v1722_v42, %v2578_v47  ;;  %v1626_v43 = vld [vmem:[#allocation2 + $0xc9] sm:$0xff]  ;;  %v2697_v42 = vadd.f32 %v1175_v14, %v1110_v9  ;;  %v1049_v9 = vld [vmem:[#allocation2 + $0xf1] sm:$0xff] }
  0xe3   : > { %v515_v58 = vadd.f32 %v2440_v59, %v514_v54  ;;  %v2689_v41 = vmul.f32 %v2593_v57, %v1626_v43 }
  0xe4   : > { %v657_v3 = vmax.f32 %v572_v53, 0.0  ;;  %v1776_v5 = vadd.f32 %v1744_v30, %v1679_v55  ;;  %3481 = vst [vmem:[#allocation5_spill] sm:$0xff] %v2683_v33  ;;  %v1097_v55 = vadd.f32 %v1065_v18, %v1000_v46  ;;  %v1291_v30 = vadd.f32 %v1259_v19, %v1193_v36 }
  0xe5   : > { %v2659_v8 = vmax.f32 %v515_v58, 0.0  ;;  %3482 = vst [vmem:[#allocation6_spill] sm:$0xff] %v2697_v42  ;;  %v2702_v58 = vmul.f32 %v1626_v43, %v2560_v34  ;;  %v1066_v18 = vmul.f32 %v2597_v60, %v2519_v2  ;;  %v2719_v19 = vmul.f32 %v1723_v20, %v2531_v11 }
  0xe6   : > { %v2666_v16 = vsel %vm700_vm2, %v657_v3, 0.0  ;;  %v1812_v17 = vadd.f32 %v2631_v37, %v1776_v5  ;;  %v2705_v3 = vmul.f32 %v1723_v20, %v2578_v47  ;;  %v1079_v5 = vmul.f32 %v1626_v43, %v2519_v2  ;;  %v1146_v43 = vld [vmem:[#allocation2 + $0xf2] sm:$0xff] }
  0xe7   : > { %940 = vst [vmem:[#allocation2 + $0x108] sm:$0xff] %v2666_v16  ;;  %v1388_v26 = vadd.f32 %v1356_v38, %v1291_v30  ;;  %v1194_v4 = vadd.f32 %v1162_v6, %v1097_v55  ;;  %v1357_v46 = vmul.f32 %v2621_v29, %v2560_v34  ;;  %v1067_v20 = vmul.f32 %v2621_v29, %v2519_v2  ;;  %v361_v55 = vld [vmem:[%s2381_s10 + $0x1a8] sm:$0xff] }
  0xe8   : > { %917 = vst [vmem:[#allocation2 + $0x50] sm:$0xff] %v2659_v8  ;;  %v1844_v35 = vmax.f32 %v1812_v17, 0.0  ;;  %v1001_v17 = vmul.f32 %v2517_v1, %v2535_v12  ;;  %v1551_v12 = vmul.f32 %v2580_v48, %v2619_v27  ;;  %v1017_v36 = vmul.f32 %v2517_v1, %v2556_v31 }
  0xe9   : > { %v574_v51 = vpop.f32.mrf.mxu2  ;;  %3483 = vst [vmem:[#allocation7_spill] sm:$0xff] %v2705_v3  ;;  %v1082_v38 = vmul.f32 %v2519_v2, %v1049_v9  ;;  %v2739_v30 = vadd.f32 %v1079_v5, %v2656_v0  ;;  %v1002_v29 = vmul.f32 %v2517_v1, %v2550_v28  ;;  %v1163_v31 = vmul.f32 %v2605_v10, %v2531_v11 }
  0xea   : > { %v575_v52 = vadd.f32 %v2440_v59, %v574_v51  ;;  %v516_v53 = vpop.f32.mrf.mxu0  ;;  %v1875_v54 = vpack.c.bf16 %v1844_v35, %v1843_v45  ;;  %3484 = vst [vmem:[#allocation8_spill] sm:$0xff] %v2719_v19  ;;  %v1453_v45 = vmul.f32 %v2605_v10, %v2578_v47  ;;  %v1292_v51 = vadd.f32 %v1260_v7, %v1194_v4 }
  0xeb   : > { %v517_v56 = vadd.f32 %v2440_v59, %v516_v53  ;;  %3485 = vst [vmem:[#allocation9_spill] sm:$0xff] %v2739_v30  ;;  %v1099_v5 = vadd.f32 %v1067_v20, %v1002_v29  ;;  %v1261_v28 = vmul.f32 %v2546_v23, %v2619_v27  ;;  %v1018_v20 = vmul.f32 %v2517_v1, %v655_v49 }
  0xec   : > { %v2708_v24 = vmax.f32 %v575_v52, 0.0  ;;  %1967 = vmatmul.bf16.vlgmr.msra.gmra.mxu1 %v1875_v54  ;;  %v1485_v52 = vadd.f32 %v1453_v45, %v1388_v26  ;;  %v360_v54 = vld [vmem:[%s2381_s10 + $0x1a0] sm:$0xff]  ;;  %v1389_v26 = vadd.f32 %v1357_v46, %v1292_v51  ;;  %v1179_v45 = vmul.f32 %v2531_v11, %v1146_v43 }
  0xed   : > { %v635_v14 = vmax.f32 %v517_v56, 0.0  ;;  %v388_v6 = vpack.c.bf16 %v361_v55, %v360_v54  ;;  %v1454_v54 = vmul.f32 %v2623_v32, %v2578_v47  ;;  %v1552_v46 = vmul.f32 %v2580_v48, %v2659_v8 }
  0xee   : > { %941 = vst [vmem:[#allocation2 + $0x110] sm:$0xff] %v2708_v24  ;;  %v1583_v4 = vadd.f32 %v1551_v12, %v1485_v52  ;;  %v1164_v51 = vmul.f32 %v2623_v32, %v2531_v11 }
  0xef   : > { %v864_v60 = vsel %vm705_vm3, %v635_v14, 0.0  ;;  %v1615_v35 = vld [vmem:[#allocation2 + $0x49] sm:$0xff]  ;;  %v1098_v14 = vadd.f32 %v1066_v18, %v1001_v17  ;;  %2203 = vmatmul.msk.bf16.gmra.mxu3 %vm394_vm1, %v388_v6  ;;  %v1050_v17 = vld [vmem:[#allocation2 + $0xf9] sm:$0xff]  ;;  %v1114_v18 = vadd.f32 %v1082_v38, %v1017_v36  ;;  %v1486_v38 = vadd.f32 %v1454_v54, %v1389_v26 }
  0xf0   : > { %918 = vst [vmem:[#allocation2 + $0x58] sm:$0xff] %v864_v60  ;;  %v1648_v53 = vmul.f32 %v2593_v57, %v1615_v35  ;;  %v2748_v0 = vld [vmem:[#allocation2 + $0x4a] sm:$0xff]  ;;  %v1147_v6 = vld [vmem:[#allocation2 + $0xfa] sm:$0xff]  ;;  %v1196_v40 = vadd.f32 %v1164_v51, %v1099_v5  ;;  %v1262_v26 = vmul.f32 %v2546_v23, %v2659_v8  ;;  %v1068_v5 = vmul.f32 %v1615_v35, %v2519_v2 }
  0xf1   : > { %v576_v56 = vpop.f32.mrf.mxu2  ;;  %v1195_v52 = vadd.f32 %v1163_v31, %v1098_v14  ;;  %v1745_v55 = vmul.f32 %v2607_v13, %v2748_v0  ;;  %v1211_v14 = vadd.f32 %v1179_v45, %v1114_v18  ;;  %v1584_v31 = vadd.f32 %v1552_v46, %v1486_v38 }
  0xf2   : > { %v577_v9 = vadd.f32 %v2440_v59, %v576_v56  ;;  %v519_v7 = vpop.f32.mrf.mxu0  ;;  %v1680_v12 = vadd.f32 %v1648_v53, %v1583_v4  ;;  %v1083_v56 = vmul.f32 %v2519_v2, %v1050_v17  ;;  %v1180_v17 = vmul.f32 %v2531_v11, %v1147_v6 }
  0xf3   : > { %v520_v60 = vadd.f32 %v2440_v59, %v519_v7  ;;  %v1293_v49 = vadd.f32 %v1261_v28, %v1195_v52  ;;  %v1004_v51 = vmul.f32 %v2517_v1, %v2659_v8  ;;  %v1019_v52 = vmul.f32 %v2517_v1, %v2666_v16 }
  0xf4   : > { %v659_v10 = vmax.f32 %v577_v9, 0.0  ;;  %v1777_v7 = vadd.f32 %v1745_v55, %v1680_v12  ;;  %v1115_v46 = vadd.f32 %v1083_v56, %v1018_v20  ;;  %v1294_v55 = vadd.f32 %v1262_v26, %v1196_v40 }
  0xf5   : > { %v636_v43 = vmax.f32 %v520_v60, 0.0  ;;  %v1358_v60 = vmul.f32 %v1615_v35, %v2560_v34  ;;  %v1341_v6 = vld [vmem:[#allocation2 + $0x109] sm:$0xff]  ;;  %v1278_v56 = vmul.f32 %v2546_v23, %v2708_v24  ;;  %v1165_v26 = vmul.f32 %v2748_v0, %v2531_v11 }
  0xf6   : > { %v888_v36 = vsel %vm705_vm3, %v659_v10, 0.0  ;;  %v1277_v10 = vmul.f32 %v2546_v23, %v2666_v16  ;;  %v1813_v38 = vadd.f32 %v2631_v37, %v1777_v7  ;;  %v1212_v16 = vadd.f32 %v1180_v17, %v1115_v46 }
  0xf7   : > { %942 = vst [vmem:[#allocation2 + $0x118] sm:$0xff] %v888_v36  ;;  %v2769_v53 = vsel %vm700_vm2, %v636_v43, 0.0  ;;  %v1616_v32 = vld [vmem:[#allocation2 + $0x51] sm:$0xff]  ;;  %v1003_v43 = vmul.f32 %v2517_v1, %v2619_v27  ;;  %v1390_v20 = vadd.f32 %v1358_v60, %v1293_v49  ;;  %v1455_v49 = vmul.f32 %v2748_v0, %v2578_v47 }
  0xf8   : > { %v2771_v29 = vld [vmem:[#allocation2 + $0x52] sm:$0xff]  ;;  %919 = vst [vmem:[#allocation2 + $0x60] sm:$0xff] %v2769_v53  ;;  %v1649_v9 = vmul.f32 %v2593_v57, %v1616_v32  ;;  %v1359_v40 = vmul.f32 %v1616_v32, %v2560_v34  ;;  %v1374_v7 = vmul.f32 %v2560_v34, %v1341_v6  ;;  %v1845_v60 = vmax.f32 %v1813_v38, 0.0 }
  0xf9   : > { %v579_v4 = vpop.f32.mrf.mxu2  ;;  %v1746_v54 = vmul.f32 %v2607_v13, %v2771_v29  ;;  %v1069_v17 = vmul.f32 %v1616_v32, %v2519_v2  ;;  %v1084_v38 = vmul.f32 %v1341_v6, %v2519_v2  ;;  %v1166_v6 = vmul.f32 %v2771_v29, %v2531_v11 }
  0xfa   : > { %v580_v45 = vadd.f32 %v2440_v59, %v579_v4  ;;  %v521_v28 = vpop.f32.mrf.mxu0  ;;  %v1681_v18 = vadd.f32 %v1649_v9, %v1584_v31  ;;  %v1100_v9 = vadd.f32 %v1068_v5, %v1003_v43  ;;  %v1309_v4 = vadd.f32 %v1277_v10, %v1211_v14 }
  0xfb   : > { %v522_v12 = vadd.f32 %v2440_v59, %v521_v28  ;;  %v1020_v14 = vmul.f32 %v2517_v1, %v2708_v24  ;;  %v1487_v28 = vadd.f32 %v1455_v49, %v1390_v20  ;;  %v1101_v49 = vadd.f32 %v1069_v17, %v1004_v51 }
  0xfc   : > { %v660_v35 = vmax.f32 %v580_v45, 0.0  ;;  %v1778_v36 = vadd.f32 %v1746_v54, %v1681_v18  ;;  %v1438_v45 = vld [vmem:[#allocation2 + $0x10a] sm:$0xff]  ;;  %v1310_v18 = vadd.f32 %v1278_v56, %v1212_v16  ;;  %v1406_v24 = vadd.f32 %v1374_v7, %v1309_v4 }
  0xfd   : > { %v2793_v31 = vmax.f32 %v522_v12, 0.0  ;;  %v1471_v46 = vmul.f32 %v2578_v47, %v1438_v45  ;;  %v1197_v12 = vadd.f32 %v1165_v26, %v1100_v9  ;;  %v1181_v20 = vmul.f32 %v1438_v45, %v2531_v11 }
  0xfe   : > { %v2799_v27 = vsel %vm700_vm2, %v660_v35, 0.0  ;;  %v1814_v8 = vadd.f32 %v2631_v37, %v1778_v36  ;;  %v1342_v54 = vld [vmem:[#allocation2 + $0x111] sm:$0xff]  ;;  %v1553_v36 = vmul.f32 %v2580_v48, %v2769_v53  ;;  %v1456_v9 = vmul.f32 %v2771_v29, %v2578_v47 }
  0xff   : > { %943 = vst [vmem:[#allocation2 + $0x120] sm:$0xff] %v2799_v27  ;;  %v1375_v16 = vmul.f32 %v2560_v34, %v1342_v54  ;;  %v1085_v4 = vmul.f32 %v1342_v54, %v2519_v2  ;;  %v1554_v45 = vmul.f32 %v2580_v48, %v2793_v31  ;;  %v1569_v7 = vmul.f32 %v2580_v48, %v2799_v27 }
 0x100   : > { %920 = vst [vmem:[#allocation2 + $0x68] sm:$0xff] %v2793_v31  ;;  %v1846_v5 = vmax.f32 %v1814_v8, 0.0  ;;  %v1391_v8 = vadd.f32 %v1359_v40, %v1294_v55  ;;  %v1263_v55 = vmul.f32 %v2546_v23, %v2769_v53  ;;  %v1585_v40 = vadd.f32 %v1553_v36, %v1487_v28 }
 0x101   : > { %v581_v10 = vpop.f32.mrf.mxu2  ;;  %v1116_v51 = vadd.f32 %v1084_v38, %v1019_v52  ;;  %v1198_v28 = vadd.f32 %v1166_v6, %v1101_v49  ;;  %v1117_v42 = vadd.f32 %v1085_v4, %v1020_v14  ;;  %v1005_v38 = vmul.f32 %v2517_v1, %v2769_v53 }
 0x102   : > { %v582_v43 = vadd.f32 %v2440_v59, %v581_v10  ;;  %v524_v35 = vpop.f32.mrf.mxu0  ;;  %v1876_v0 = vpack.c.bf16 %v1846_v5, %v1845_v60  ;;  %v1439_v60 = vld [vmem:[#allocation2 + $0x112] sm:$0xff]  ;;  %v1488_v17 = vadd.f32 %v1456_v9, %v1391_v8  ;;  %v1503_v10 = vadd.f32 %v1471_v46, %v1406_v24 }
 0x103   : > { %v525_v32 = vadd.f32 %v2440_v59, %v524_v35  ;;  %v1407_v35 = vadd.f32 %v1375_v16, %v1310_v18  ;;  %v1182_v52 = vmul.f32 %v1439_v60, %v2531_v11  ;;  %v1279_v14 = vmul.f32 %v2546_v23, %v2799_v27 }
 0x104   : > { %v2820_v56 = vmax.f32 %v582_v43, 0.0  ;;  %1972 = vmatmul.bf16.gmra.mxu1 %v1876_v0  ;;  %v1264_v43 = vmul.f32 %v2546_v23, %v2793_v31  ;;  %v1472_v0 = vmul.f32 %v2578_v47, %v1439_v60  ;;  %v1586_v24 = vadd.f32 %v1554_v45, %v1488_v17 }
 0x105   : > { %v638_v26 = vmax.f32 %v525_v32, 0.0  ;;  %v1295_v32 = vadd.f32 %v1263_v55, %v1197_v12  ;;  %v1601_v9 = vadd.f32 %v1569_v7, %v1503_v10  ;;  %v1214_v45 = vadd.f32 %v1182_v52, %v1117_v42 }
 0x106   : > { %944 = vst [vmem:[#allocation2 + $0x128] sm:$0xff] %v2820_v56  ;;  %v1296_v16 = vadd.f32 %v1264_v43, %v1198_v28  ;;  %v1504_v6 = vadd.f32 %v1472_v0, %v1407_v35  ;;  %v1570_v53 = vmul.f32 %v2580_v48, %v2820_v56  ;;  %v2864_v43 = vmul.f32 %v2517_v1, %v2799_v27 }
 0x107   : > { %v867_v5 = vsel %vm705_vm3, %v638_v26, 0.0  ;;  %v1617_v29 = vld [vmem:[#allocation2 + $0x61] sm:$0xff]  ;;  %v1213_v26 = vadd.f32 %v1181_v20, %v1116_v51  ;;  %v2853_v20 = vmul.f32 %v2517_v1, %v2793_v31  ;;  %v1280_v35 = vmul.f32 %v2546_v23, %v2820_v56 }
 0x108   : > { %921 = vst [vmem:[#allocation2 + $0x70] sm:$0xff] %v867_v5  ;;  %v1650_v54 = vmul.f32 %v2593_v57, %v1617_v29  ;;  %v1714_v18 = vld [vmem:[#allocation2 + $0x62] sm:$0xff]  ;;  %v1360_v49 = vmul.f32 %v1617_v29, %v2560_v34  ;;  %v1070_v7 = vmul.f32 %v1617_v29, %v2519_v2  ;;  %v1602_v52 = vadd.f32 %v1570_v53, %v1504_v6 }
 0x109   : > { %v584_v36 = vpop.f32.mrf.mxu2  ;;  %v1747_v17 = vmul.f32 %v2607_v13, %v1714_v18  ;;  %v1311_v0 = vadd.f32 %v1279_v14, %v1213_v26  ;;  %v2876_v27 = vmul.f32 %v2517_v1, %v2820_v56  ;;  %v1312_v53 = vadd.f32 %v1280_v35, %v1214_v45 }
 0x10a   : > { %v585_v46 = vadd.f32 %v2440_v59, %v584_v36  ;;  %v526_v8 = vpop.f32.mrf.mxu0  ;;  %v1682_v60 = vadd.f32 %v1650_v54, %v1585_v40  ;;  %v1392_v54 = vadd.f32 %v1360_v49, %v1295_v32  ;;  %v1457_v32 = vmul.f32 %v1714_v18, %v2578_v47 }
 0x10b   : > { %v527_v5 = vadd.f32 %v2440_v59, %v526_v8  ;;  %v1102_v49 = vadd.f32 %v1070_v7, %v1005_v38 }
 0x10c   : > { %v662_v12 = vmax.f32 %v585_v46, 0.0  ;;  %v1779_v36 = vadd.f32 %v1747_v17, %v1682_v60  ;;  %v1489_v56 = vadd.f32 %v1457_v32, %v1392_v54 }
 0x10d   : > { %v639_v55 = vmax.f32 %v527_v5, 0.0  ;;  %v1633_v4 = vld [vmem:[#allocation2 + $0x121] sm:$0xff] }
 0x10e   : > { %v891_v51 = vsel %vm705_vm3, %v662_v12, 0.0  ;;  %v1666_v40 = vmul.f32 %v2593_v57, %v1633_v4  ;;  %v2860_v10 = vld [vmem:[#allocation2 + $0x122] sm:$0xff]  ;;  %v1376_v38 = vmul.f32 %v1633_v4, %v2560_v34 }
 0x10f   : > { %945 = vst [vmem:[#allocation2 + $0x130] sm:$0xff] %v891_v51  ;;  %v2868_v42 = vsel %vm700_vm2, %v639_v55, 0.0  ;;  %v1618_v31 = vld [vmem:[#allocation2 + $0x69] sm:$0xff]  ;;  %v1763_v5 = vmul.f32 %v2607_v13, %v2860_v10 }
 0x110   : > { %v1715_v29 = vld [vmem:[#allocation2 + $0x6a] sm:$0xff]  ;;  %922 = vst [vmem:[#allocation2 + $0x78] sm:$0xff] %v2868_v42  ;;  %v1651_v28 = vmul.f32 %v2593_v57, %v1618_v31  ;;  %v1698_v8 = vadd.f32 %v1666_v40, %v1601_v9  ;;  %v1361_v60 = vmul.f32 %v1618_v31, %v2560_v34  ;;  %v1167_v9 = vmul.f32 %v1714_v18, %v2531_v11 }
 0x111   : > { %v586_v46 = vpop.f32.mrf.mxu2  ;;  %v1748_v55 = vmul.f32 %v2607_v13, %v1715_v29  ;;  %v1815_v40 = vadd.f32 %v2631_v37, %v1779_v36  ;;  %v1071_v36 = vmul.f32 %v1618_v31, %v2519_v2 }
 0x112   : > { %v587_v26 = vadd.f32 %v2440_v59, %v586_v46  ;;  %v529_v14 = vpop.f32.mrf.mxu0  ;;  %v1683_v12 = vadd.f32 %v1651_v28, %v1586_v24  ;;  %v1795_v46 = vadd.f32 %v1763_v5, %v1698_v8  ;;  %v1555_v24 = vmul.f32 %v2580_v48, %v2868_v42 }
 0x113   : > { %v530_v6 = vadd.f32 %v2440_v59, %v529_v14  ;;  %v1199_v28 = vadd.f32 %v1167_v9, %v1102_v49  ;;  %v1393_v35 = vadd.f32 %v1361_v60, %v1296_v16  ;;  %v1473_v5 = vmul.f32 %v2860_v10, %v2578_v47 }
 0x114   : > { %v663_v51 = vmax.f32 %v587_v26, 0.0  ;;  %v1780_v17 = vadd.f32 %v1748_v55, %v1683_v12  ;;  %v1086_v49 = vmul.f32 %v1633_v4, %v2519_v2  ;;  %v1847_v26 = vmax.f32 %v1815_v40, 0.0 }
 0x115   : > { %v2888_v7 = vmax.f32 %v530_v6, 0.0  ;;  %v1458_v55 = vmul.f32 %v1715_v29, %v2578_v47  ;;  %v1408_v16 = vadd.f32 %v1376_v38, %v1311_v0  ;;  %v1831_v6 = vadd.f32 %v2631_v37, %v1795_v46 }
 0x116   : > { %v2894_v14 = vsel %vm700_vm2, %v663_v51, 0.0  ;;  %v1816_v45 = vadd.f32 %v2631_v37, %v1780_v17  ;;  %v1634_v18 = vld [vmem:[#allocation2 + $0x129] sm:$0xff]  ;;  %v1587_v9 = vadd.f32 %v1555_v24, %v1489_v56  ;;  %v1103_v4 = vadd.f32 %v1071_v36, %v2853_v20 }
 0x117   : > { %v1731_v54 = vld [vmem:[#allocation2 + $0x12a] sm:$0xff]  ;;  %946 = vst [vmem:[#allocation2 + $0x138] sm:$0xff] %v2894_v14  ;;  %v1667_v32 = vmul.f32 %v2593_v57, %v1634_v18  ;;  %v1377_v51 = vmul.f32 %v1634_v18, %v2560_v34  ;;  %v1490_v33 = vadd.f32 %v1458_v55, %v1393_v35  ;;  %v1556_v0 = vmul.f32 %v2580_v48, %v2888_v7 }
 0x118   : > { %v1764_v8 = vmul.f32 %v2607_v13, %v1731_v54  ;;  %923 = vst [vmem:[#allocation2 + $0x80] sm:$0xff] %v2888_v7  ;;  %v1848_v12 = vmax.f32 %v1816_v45, 0.0  ;;  %v1474_v56 = vmul.f32 %v1731_v54, %v2578_v47  ;;  %v1571_v46 = vmul.f32 %v2580_v48, %v2894_v14 }
 0x119   : > { %v589_v60 = vpop.f32.mrf.mxu2  ;;  %v1699_v31 = vadd.f32 %v1667_v32, %v1602_v52  ;;  %v1168_v52 = vmul.f32 %v1715_v29, %v2531_v11  ;;  %v1265_v24 = vmul.f32 %v2546_v23, %v2868_v42  ;;  %v1266_v35 = vmul.f32 %v2546_v23, %v2888_v7 }
 0x11a   : > { %v590_v17 = vadd.f32 %v2440_v59, %v589_v60  ;;  %v531_v19 = vpop.f32.mrf.mxu0  ;;  %v1877_v30 = vpack.c.bf16 %v1848_v12, %v1847_v26  ;;  %v1863_v29 = vmax.f32 %v1831_v6, 0.0  ;;  %v1505_v36 = vadd.f32 %v1473_v5, %v1408_v16 }
 0x11b   : > { %v532_v40 = vadd.f32 %v2440_v59, %v531_v19  ;;  %v1796_v45 = vadd.f32 %v1764_v8, %v1699_v31  ;;  %v1409_v19 = vadd.f32 %v1377_v51, %v1312_v53  ;;  %v1118_v32 = vadd.f32 %v1086_v49, %v2864_v43 }
 0x11c   : > { %v2914_v38 = vmax.f32 %v590_v17, 0.0  ;;  %1977 = vmatmul.bf16.gmra.mxu1 %v1877_v30  ;;  %v1087_v30 = vmul.f32 %v1634_v18, %v2519_v2  ;;  %v1588_v12 = vadd.f32 %v1556_v0, %v1490_v33  ;;  %v1200_v60 = vadd.f32 %v1168_v52, %v1103_v4  ;;  %v2938_v33 = vld [vmem:[%s3473_s2] ss:$0 sm:$0xff] }
 0x11d   : > { %v641_v20 = vmax.f32 %v532_v40, 0.0  ;;  %v1832_v59 = vadd.f32 %v2631_v37, %v1796_v45  ;;  %v1603_v31 = vadd.f32 %v1571_v46, %v1505_v36  ;;  %v1297_v51 = vadd.f32 %v1265_v24, %v1199_v28 }
 0x11e   : > { %947 = vst [vmem:[#allocation2 + $0x140] sm:$0xff] %v2914_v38  ;;  %v1183_v6 = vmul.f32 %v2860_v10, %v2531_v11  ;;  %v1506_v18 = vadd.f32 %v1474_v56, %v1409_v19  ;;  %v2932_v17 = vadd.f32 %v1266_v35, %v1200_v60  ;;  %v1184_v43 = vmul.f32 %v1731_v54, %v2531_v11 }
 0x11f   : > { %v870_v8 = vsel %vm705_vm3, %v641_v20, 0.0  ;;  %v1864_v26 = vmax.f32 %v1832_v59, 0.0  ;;  %v1619_v55 = vld [vmem:[#allocation2 + $0x79] sm:$0xff]  ;;  %v1572_v28 = vmul.f32 %v2580_v48, %v2914_v38  ;;  %v1119_v10 = vadd.f32 %v1087_v30, %v2876_v27 }
 0x120   : > { %924 = vst [vmem:[#allocation2 + $0x88] sm:$0xff] %v870_v8  ;;  %v1652_v53 = vmul.f32 %v2593_v57, %v1619_v55  ;;  %v1716_v40 = vld [vmem:[#allocation2 + $0x7a] sm:$0xff]  ;;  %v1281_v45 = vmul.f32 %v2546_v23, %v2894_v14  ;;  %v1362_v52 = vmul.f32 %v1619_v55, %v2560_v34  ;;  %v1007_v56 = vmul.f32 %v2517_v1, %v2868_v42 }
 0x121   : > { %v591_v5 = vpop.f32.mrf.mxu2  ;;  %v1885_v16 = vpack.c.bf16 %v1864_v26, %v1863_v29  ;;  %v1215_v24 = vadd.f32 %v1183_v6, %v1118_v32  ;;  %v1282_v20 = vmul.f32 %v2546_v23, %v2914_v38  ;;  %v2954_v27 = vmul.f32 %v2517_v1, %v2888_v7 }
 0x122   : > { %v592_v49 = vadd.f32 %v2938_v33, %v591_v5  ;;  %v534_v4 = vpop.f32.mrf.mxu0  ;;  %v1684_v54 = vadd.f32 %v1652_v53, %v1587_v9  ;;  %v1749_v19 = vmul.f32 %v2607_v13, %v1716_v40  ;;  %v1072_v9 = vmul.f32 %v1619_v55, %v2519_v2  ;;  %v609_v5 = vpop.f32.mrf.mxu3 }
 0x123   : > { %v535_v0 = vadd.f32 %v2938_v33, %v534_v4  ;;  %2017 = vmatmul.bf16.vlgmr.msrb.gmra.mxu3 %v1885_v16  ;;  %v2962_v29 = vmul.f32 %v2517_v1, %v2894_v14  ;;  %v1604_v36 = vadd.f32 %v1572_v28, %v1506_v18  ;;  %v1216_v32 = vadd.f32 %v1184_v43, %v1119_v10 }
 0x124   : > { %v665_v46 = vmax.f32 %v592_v49, 0.0  ;;  %v1781_v14 = vadd.f32 %v1749_v19, %v1684_v54  ;;  %v1394_v60 = vadd.f32 %v1362_v52, %v1297_v51  ;;  %v1459_v53 = vmul.f32 %v1716_v40, %v2578_v47 }
 0x125   : > { %v642_v59 = vmax.f32 %v535_v0, 0.0  ;;  %v2957_v35 = vld [vmem:[#allocation2 + $0x139] sm:$0xff]  ;;  %v1313_v16 = vadd.f32 %v1281_v45, %v1215_v24  ;;  %v2979_v18 = vadd.f32 %v1282_v20, %v1216_v32  ;;  %v1169_v43 = vmul.f32 %v1716_v40, %v2531_v11 }
 0x126   : > { %v894_v42 = vsel %vm705_vm3, %v665_v46, 0.0  ;;  %v1668_v30 = vmul.f32 %v2593_v57, %v2957_v35  ;;  %v2968_v7 = vld [vmem:[#allocation2 + $0x13a] sm:$0xff]  ;;  %v610_v28 = vadd.f32 %v2938_v33, %v609_v5  ;;  %v1104_v10 = vadd.f32 %v1072_v9, %v1007_v56 }
 0x127   : > { %948 = vst [vmem:[#allocation2 + $0x148] sm:$0xff] %v894_v42  ;;  %v2972_v8 = vsel %vm700_vm2, %v642_v59, 0.0  ;;  %v1620_v26 = vld [vmem:[#allocation2 + $0x81] sm:$0xff]  ;;  %v1765_v4 = vmul.f32 %v2607_v13, %v2968_v7  ;;  %v2987_v51 = vmul.f32 %v2517_v1, %v2914_v38  ;;  %v1817_v24 = vadd.f32 %v2631_v37, %v1781_v14 }
 0x128   : > { %v2974_v55 = vld [vmem:[#allocation2 + $0x82] sm:$0xff]  ;;  %925 = vst [vmem:[#allocation2 + $0x90] sm:$0xff] %v2972_v8  ;;  %v1653_v6 = vmul.f32 %v2593_v57, %v1620_v26  ;;  %v1700_v46 = vadd.f32 %v1668_v30, %v1603_v31  ;;  %v672_v20 = vmax.f32 %v610_v28, 0.0  ;;  %v1491_v59 = vadd.f32 %v1459_v53, %v1394_v60 }
 0x129   : > { %v594_v49 = vpop.f32.mrf.mxu2  ;;  %v1750_v45 = vmul.f32 %v2607_v13, %v2974_v55  ;;  %v1363_v9 = vmul.f32 %v1620_v26, %v2560_v34  ;;  %v1378_v38 = vmul.f32 %v2957_v35, %v2560_v34  ;;  %v1557_v31 = vmul.f32 %v2580_v48, %v2972_v8 }
 0x12a   : > { %v595_v0 = vadd.f32 %v2938_v33, %v594_v49  ;;  %v536_v54 = vpop.f32.mrf.mxu0  ;;  %v1685_v52 = vadd.f32 %v1653_v6, %v1588_v12  ;;  %v3001_v12 = vsel %vm700_vm2, %v672_v20, 0.0  ;;  %v1475_v30 = vmul.f32 %v2968_v7, %v2578_v47 }
 0x12b   : > { %v537_v40 = vadd.f32 %v2938_v33, %v536_v54  ;;  %v1797_v6 = vadd.f32 %v1765_v4, %v1700_v46  ;;  %955 = vst [vmem:[#allocation2 + $0x180] sm:$0xff] %v3001_v12  ;;  %v1201_v5 = vadd.f32 %v1169_v43, %v1104_v10  ;;  %v1849_v49 = vmax.f32 %v1817_v24, 0.0  ;;  %v611_v4 = vpop.f32.mrf.mxu3 }
 0x12c   : > { %v666_v19 = vmax.f32 %v595_v0, 0.0  ;;  %v1782_v56 = vadd.f32 %v1750_v45, %v1685_v52  ;;  %v1460_v54 = vmul.f32 %v2974_v55, %v2578_v47  ;;  %v1395_v45 = vadd.f32 %v1363_v9, %v2932_v17 }
 0x12d   : > { %v2997_v42 = vmax.f32 %v537_v40, 0.0  ;;  %v1410_v46 = vadd.f32 %v1378_v38, %v1313_v16  ;;  %v1073_v43 = vmul.f32 %v1620_v26, %v2519_v2  ;;  %v1589_v24 = vadd.f32 %v1557_v31, %v1491_v59 }
 0x12e   : > { %v3009_v32 = vsel %vm700_vm2, %v666_v19, 0.0  ;;  %v1818_v14 = vadd.f32 %v2631_v37, %v1782_v56  ;;  %v1636_v60 = vld [vmem:[#allocation2 + $0x141] sm:$0xff]  ;;  %v612_v20 = vadd.f32 %v2938_v33, %v611_v4  ;;  %v1833_v63 = vadd.f32 %v2631_v37, %v1797_v6 }
 0x12f   : > { %v3012_v53 = vld [vmem:[#allocation2 + $0x142] sm:$0xff]  ;;  %949 = vst [vmem:[#allocation2 + $0x150] sm:$0xff] %v3009_v32  ;;  %v1669_v28 = vmul.f32 %v2593_v57, %v1636_v60  ;;  %v1379_v19 = vmul.f32 %v1636_v60, %v2560_v34  ;;  %v1558_v17 = vmul.f32 %v2580_v48, %v2997_v42  ;;  %v1492_v38 = vadd.f32 %v1460_v54, %v1395_v45 }
 0x130   : > { %v1766_v0 = vmul.f32 %v2607_v13, %v3012_v53  ;;  %926 = vst [vmem:[#allocation2 + $0x98] sm:$0xff] %v2997_v42  ;;  %v1850_v52 = vmax.f32 %v1818_v14, 0.0  ;;  %v3031_v26 = vmax.f32 %v612_v20, 0.0  ;;  %v1507_v31 = vadd.f32 %v1475_v30, %v1410_v46 }
 0x131   : > { %v596_v10 = vpop.f32.mrf.mxu2  ;;  %v1701_v40 = vadd.f32 %v1669_v28, %v1604_v36  ;;  %v1573_v36 = vmul.f32 %v2580_v48, %v3009_v32  ;;  %v1105_v14 = vadd.f32 %v1073_v43, %v2954_v27  ;;  %v1476_v28 = vmul.f32 %v3012_v53, %v2578_v47 }
 0x132   : > { %v597_v56 = vadd.f32 %v2938_v33, %v596_v10  ;;  %v539_v3 = vpop.f32.mrf.mxu0  ;;  %v1878_v22 = vpack.c.bf16 %v1850_v52, %v1849_v49  ;;  %956 = vst [vmem:[#allocation2 + $0x188] sm:$0xff] %v3031_v26  ;;  %v3044_v52 = vadd.f32 %v1558_v17, %v1492_v38  ;;  %v1267_v27 = vmul.f32 %v2546_v23, %v2972_v8 }
 0x133   : > { %v540_v16 = vadd.f32 %v2938_v33, %v539_v3  ;;  %v1798_v9 = vadd.f32 %v1766_v0, %v1701_v40  ;;  %v1411_v3 = vadd.f32 %v1379_v19, %v2979_v18  ;;  %v1865_v0 = vmax.f32 %v1833_v63, 0.0  ;;  %v614_v46 = vpop.f32.mrf.mxu3 }
 0x134   : > { %v3035_v59 = vmax.f32 %v597_v56, 0.0  ;;  %1982 = vmatmul.bf16.gmra.mxu1 %v1878_v22  ;;  %v1170_v22 = vmul.f32 %v2974_v55, %v2531_v11  ;;  %v1605_v18 = vadd.f32 %v1573_v36, %v1507_v31  ;;  %v1268_v4 = vmul.f32 %v2546_v23, %v2997_v42 }
 0x135   : > { %v644_v49 = vmax.f32 %v540_v16, 0.0  ;;  %v1834_v6 = vadd.f32 %v2631_v37, %v1798_v9  ;;  %v1088_v55 = vmul.f32 %v2957_v35, %v2519_v2  ;;  %v1089_v10 = vmul.f32 %v1636_v60, %v2519_v2 }
 0x136   : > { %950 = vst [vmem:[#allocation2 + $0x158] sm:$0xff] %v3035_v59  ;;  %v1202_v43 = vadd.f32 %v1170_v22, %v1105_v14  ;;  %v1508_v19 = vadd.f32 %v1476_v28, %v1411_v3  ;;  %v615_v56 = vadd.f32 %v2938_v33, %v614_v46  ;;  %v1574_v38 = vmul.f32 %v2580_v48, %v3035_v59 }
 0x137   : > { %v873_v30 = vsel %vm705_vm3, %v644_v49, 0.0  ;;  %v1866_v54 = vmax.f32 %v1834_v6, 0.0  ;;  %v3052_v45 = vld [vmem:[#allocation2 + $0x91] sm:$0xff]  ;;  %v1299_v31 = vadd.f32 %v1267_v27, %v1201_v5  ;;  %v1185_v35 = vmul.f32 %v2968_v7, %v2531_v11 }
 0x138   : > { %927 = vst [vmem:[#allocation2 + $0xa0] sm:$0xff] %v873_v30  ;;  %v1654_v63 = vmul.f32 %v2593_v57, %v3052_v45  ;;  %v1364_v17 = vmul.f32 %v3052_v45, %v2560_v34  ;;  %v3065_v36 = vld [vmem:[#allocation2 + $0x92] sm:$0xff]  ;;  %v674_v49 = vmax.f32 %v615_v56, 0.0  ;;  %v1300_v6 = vadd.f32 %v1268_v4, %v1202_v43 }
 0x139   : > { %v599_v40 = vpop.f32.mrf.mxu2  ;;  %v1886_v20 = vpack.c.bf16 %v1866_v54, %v1865_v0  ;;  %v1120_v28 = vadd.f32 %v1088_v55, %v2962_v29  ;;  %v1121_v0 = vadd.f32 %v1089_v10, %v2987_v51  ;;  %v1186_v22 = vmul.f32 %v3012_v53, %v2531_v11 }
 0x13a   : > { %v600_v16 = vadd.f32 %v2938_v33, %v599_v40  ;;  %v541_v9 = vpop.f32.mrf.mxu0  ;;  %v1686_v14 = vadd.f32 %v1654_v63, %v1589_v24  ;;  %v1751_v5 = vmul.f32 %v2607_v13, %v3065_v36  ;;  %v903_v24 = vsel %vm705_vm3, %v674_v49, 0.0 }
 0x13b   : > { %v542_v60 = vadd.f32 %v2938_v33, %v541_v9  ;;  %2022 = vmatmul.bf16.gmra.mxu3 %v1886_v20  ;;  %v1396_v54 = vadd.f32 %v1364_v17, %v1299_v31  ;;  %v1606_v4 = vadd.f32 %v1574_v38, %v1508_v19  ;;  %957 = vst [vmem:[#allocation2 + $0x190] sm:$0xff] %v903_v24 }
 0x13c   : > { %v668_v3 = vmax.f32 %v600_v16, 0.0  ;;  %v1461_v53 = vmul.f32 %v3065_v36, %v2578_v47  ;;  %v1783_v55 = vadd.f32 %v1751_v5, %v1686_v14  ;;  %v1283_v40 = vmul.f32 %v2546_v23, %v3009_v32  ;;  %v616_v16 = vpop.f32.mrf.mxu3 }
 0x13d   : > { %v645_v30 = vmax.f32 %v542_v60, 0.0  ;;  %v3078_v27 = vld [vmem:[#allocation2 + $0x151] sm:$0xff]  ;;  %v1217_v56 = vadd.f32 %v1185_v35, %v1120_v28  ;;  %v1218_v17 = vadd.f32 %v1186_v22, %v1121_v0  ;;  %v1284_v60 = vmul.f32 %v2546_v23, %v3035_v59 }
 0x13e   : > { %v3080_v7 = vld [vmem:[#allocation2 + $0x152] sm:$0xff]  ;;  %v897_v29 = vsel %vm705_vm3, %v668_v3, 0.0  ;;  %v1670_v51 = vmul.f32 %v2593_v57, %v3078_v27  ;;  %v1493_v31 = vadd.f32 %v1461_v53, %v1396_v54  ;;  %v1380_v14 = vmul.f32 %v3078_v27, %v2560_v34 }
 0x13f   : > { %951 = vst [vmem:[#allocation2 + $0x160] sm:$0xff] %v897_v29  ;;  %v3092_v63 = vsel %vm700_vm2, %v645_v30, 0.0  ;;  %v1622_v46 = vld [vmem:[#allocation2 + $0x99] sm:$0xff]  ;;  %v1767_v10 = vmul.f32 %v2607_v13, %v3080_v7  ;;  %v1009_v35 = vmul.f32 %v2517_v1, %v2972_v8  ;;  %v1819_v0 = vadd.f32 %v2631_v37, %v1783_v55 }
 0x140   : > { %v3094_v43 = vld [vmem:[#allocation2 + $0x9a] sm:$0xff]  ;;  %928 = vst [vmem:[#allocation2 + $0xa8] sm:$0xff] %v3092_v63  ;;  %v1655_v20 = vmul.f32 %v2593_v57, %v1622_v46  ;;  %v1702_v19 = vadd.f32 %v1670_v51, %v1605_v18  ;;  %v1365_v38 = vmul.f32 %v1622_v46, %v2560_v34  ;;  %v1315_v5 = vadd.f32 %v1283_v40, %v1217_v56 }
 0x141   : > { %v601_v9 = vpop.f32.mrf.mxu2  ;;  %v1752_v18 = vmul.f32 %v2607_v13, %v3094_v43  ;;  %v1559_v29 = vmul.f32 %v2580_v48, %v3092_v63  ;;  %v1074_v8 = vmul.f32 %v3052_v45, %v2519_v2  ;;  %v1462_v56 = vmul.f32 %v3094_v43, %v2578_v47 }
 0x142   : > { %v602_v49 = vadd.f32 %v2938_v33, %v601_v9  ;;  %v544_v3 = vpop.f32.mrf.mxu0  ;;  %v1687_v30 = vadd.f32 %v1655_v20, %v3044_v52  ;;  %v1799_v22 = vadd.f32 %v1767_v10, %v1702_v19  ;;  %v1477_v52 = vmul.f32 %v3080_v7, %v2578_v47 }
 0x143   : > { %v545_v28 = vadd.f32 %v2938_v33, %v544_v3  ;;  %v1397_v53 = vadd.f32 %v1365_v38, %v1300_v6  ;;  %v1412_v20 = vadd.f32 %v1380_v14, %v1315_v5  ;;  %v1316_v16 = vadd.f32 %v1284_v60, %v1218_v17 }
 0x144   : > { %v669_v24 = vmax.f32 %v602_v49, 0.0  ;;  %v1784_v54 = vadd.f32 %v1752_v18, %v1687_v30  ;;  %v1835_v45 = vadd.f32 %v3136_v61, %v1799_v22  ;;  %v1851_v38 = vmax.f32 %v1819_v0, 0.0 }
 0x145   : > { %v3119_v51 = vmax.f32 %v545_v28, 0.0  ;;  %v1591_v17 = vadd.f32 %v1559_v29, %v1493_v31  ;;  %v1010_v60 = vmul.f32 %v2517_v1, %v2997_v42  ;;  %v1494_v30 = vadd.f32 %v1462_v56, %v1397_v53 }
 0x146   : > { %v3125_v55 = vsel %vm700_vm2, %v669_v24, 0.0  ;;  %v1820_v10 = vadd.f32 %v2631_v37, %v1784_v54  ;;  %v1638_v40 = vld [vmem:[#allocation2 + $0x159] sm:$0xff]  ;;  %v1075_v37 = vmul.f32 %v1622_v46, %v2519_v2  ;;  %v1509_v18 = vadd.f32 %v1477_v52, %v1412_v20 }
 0x147   : > { %v1735_v19 = vld [vmem:[#allocation2 + $0x15a] sm:$0xff]  ;;  %952 = vst [vmem:[#allocation2 + $0x168] sm:$0xff] %v3125_v55  ;;  %v1671_v6 = vmul.f32 %v2593_v57, %v1638_v40  ;;  %v1106_v28 = vadd.f32 %v1074_v8, %v1009_v35  ;;  %v1560_v46 = vmul.f32 %v2580_v48, %v3119_v51  ;;  %v1171_v0 = vmul.f32 %v3065_v36, %v2531_v11 }
 0x148   : > { %v1768_v9 = vmul.f32 %v2607_v13, %v1735_v19  ;;  %929 = vst [vmem:[#allocation2 + $0xb0] sm:$0xff] %v3119_v51  ;;  %v1852_v14 = vmax.f32 %v1820_v10, 0.0  ;;  %v1867_v29 = vmax.f32 %v1835_v45, 0.0  ;;  %v1107_v42 = vadd.f32 %v1075_v37, %v1010_v60 }
 0x149   : > { %v604_v49 = vpop.f32.mrf.mxu2  ;;  %v1703_v3 = vadd.f32 %v1671_v6, %v1606_v4  ;;  %v1381_v4 = vmul.f32 %v1638_v40, %v2560_v34  ;;  %v1478_v35 = vmul.f32 %v1735_v19, %v2578_v47  ;;  %v1025_v52 = vmul.f32 %v2517_v1, %v3009_v32 }
 0x14a   : > { %v605_v5 = vadd.f32 %v2938_v33, %v604_v49  ;;  %v546_v24 = vpop.f32.mrf.mxu0  ;;  %v1879_v54 = vpack.c.bf16 %v1852_v14, %v1851_v38  ;;  %v1269_v36 = vmul.f32 %v2546_v23, %v3092_v63  ;;  %v1090_v8 = vmul.f32 %v3078_v27, %v2519_v2 }
 0x14b   : > { %v547_v31 = vadd.f32 %v2938_v33, %v546_v24  ;;  %v1800_v22 = vadd.f32 %v1768_v9, %v1703_v3  ;;  %v1592_v56 = vadd.f32 %v1560_v46, %v1494_v30  ;;  %v1575_v6 = vmul.f32 %v2580_v48, %v3125_v55 }
 0x14c   : > { %v3149_v10 = vmax.f32 %v605_v5, 0.0  ;;  %1987 = vmatmul.bf16.gmra.mxu1 %v1879_v54  ;;  %v1172_v9 = vmul.f32 %v3094_v43, %v2531_v11  ;;  %v1091_v32 = vmul.f32 %v1638_v40, %v2519_v2  ;;  %v1203_v14 = vadd.f32 %v1171_v0, %v1106_v28 }
 0x14d   : > { %v647_v53 = vmax.f32 %v547_v31, 0.0  ;;  %v1836_v20 = vadd.f32 %v3136_v61, %v1800_v22  ;;  %v1026_v27 = vmul.f32 %v2517_v1, %v3035_v59  ;;  %v1122_v30 = vadd.f32 %v1090_v8, %v1025_v52 }
 0x14e   : > { %953 = vst [vmem:[#allocation2 + $0x170] sm:$0xff] %v3149_v10  ;;  %v1187_v43 = vmul.f32 %v3080_v7, %v2531_v11  ;;  %v1413_v24 = vadd.f32 %v1381_v4, %v1316_v16  ;;  %v1270_v28 = vmul.f32 %v2546_v23, %v3119_v51  ;;  %v1301_v54 = vadd.f32 %v1269_v36, %v1203_v14 }
 0x14f   : > { %v876_v45 = vsel %vm705_vm3, %v647_v53, 0.0  ;;  %v1868_v37 = vmax.f32 %v1836_v20, 0.0  ;;  %v1623_v38 = vld [vmem:[#allocation2 + $0xa9] sm:$0xff]  ;;  %v1123_v0 = vadd.f32 %v1091_v32, %v1026_v27  ;;  %v1188_v31 = vmul.f32 %v1735_v19, %v2531_v11 }
 0x150   : > { %930 = vst [vmem:[#allocation2 + $0xb8] sm:$0xff] %v876_v45  ;;  %v1656_v60 = vmul.f32 %v2593_v57, %v1623_v38  ;;  %v3171_v49 = vld [vmem:[#allocation2 + $0xaa] sm:$0xff]  ;;  %v1366_v3 = vmul.f32 %v1623_v38, %v2560_v34  ;;  %v1576_v7 = vmul.f32 %v2580_v48, %v3149_v10  ;;  %v1204_v52 = vadd.f32 %v1172_v9, %v1107_v42 }
 0x151   : > { %v606_v40 = vpop.f32.mrf.mxu2  ;;  %v1887_v5 = vpack.c.bf16 %v1868_v37, %v1867_v29  ;;  %v1753_v22 = vmul.f32 %v2607_v13, %v3171_v49  ;;  %v1219_v4 = vadd.f32 %v1187_v43, %v1122_v30  ;;  %v1285_v53 = vmul.f32 %v2546_v23, %v3125_v55 }
 0x152   : > { %v607_v59 = vadd.f32 %v2938_v33, %v606_v40  ;;  %v1688_v46 = vadd.f32 %v1656_v60, %v1591_v17  ;;  %v1398_v29 = vadd.f32 %v1366_v3, %v1301_v54  ;;  %v1286_v33 = vmul.f32 %v2546_v23, %v3149_v10  ;;  %v3188_v17 = vld [vmem:[#allocation2 + $0x181] sm:$0xff] }
 0x153   : > { %2027 = vmatmul.bf16.gmra.mxu3 %v1887_v5  ;;  %v1510_v20 = vadd.f32 %v1478_v35, %v1413_v24  ;;  %v1607_v36 = vadd.f32 %v1575_v6, %v1509_v18  ;;  %v1463_v32 = vmul.f32 %v3171_v49, %v2578_v47  ;;  %v1302_v37 = vadd.f32 %v1270_v28, %v1204_v52 }
 0x154   : > { %v671_v16 = vmax.f32 %v607_v59, 0.0  ;;  %v1785_v19 = vadd.f32 %v1753_v22, %v1688_v46  ;;  %v1220_v14 = vadd.f32 %v1188_v31, %v1123_v0  ;;  %v1577_v6 = vmul.f32 %v2580_v48, %v3001_v12 }
 0x155   : > { %v3190_v8 = vld [vmem:[#allocation2 + $0x169] sm:$0xff]  ;;  %v1608_v35 = vadd.f32 %v1576_v7, %v1510_v20  ;;  %v1495_v18 = vadd.f32 %v1463_v32, %v1398_v29  ;;  %v3204_v3 = vmul.f32 %v2593_v57, %v3188_v17  ;;  %v1317_v30 = vadd.f32 %v1285_v53, %v1219_v4 }
 0x156   : > { %v900_v42 = vsel %vm705_vm3, %v671_v16, 0.0  ;;  %v1672_v9 = vmul.f32 %v2593_v57, %v3190_v8  ;;  %v3198_v45 = vld [vmem:[#allocation2 + $0x16a] sm:$0xff]  ;;  %v1318_v43 = vadd.f32 %v1286_v33, %v1220_v14  ;;  %v1382_v40 = vmul.f32 %v3190_v8, %v2560_v34 }
 0x157   : > { %954 = vst [vmem:[#allocation2 + $0x178] sm:$0xff] %v900_v42  ;;  %v1624_v27 = vld [vmem:[#allocation2 + $0xb1] sm:$0xff]  ;;  %v1821_v5 = vadd.f32 %v3136_v61, %v1785_v19  ;;  %v1769_v24 = vmul.f32 %v2607_v13, %v3198_v45  ;;  %v1578_v54 = vmul.f32 %v2580_v48, %v3031_v26  ;;  %v1479_v31 = vmul.f32 %v3198_v45, %v2578_v47 }
 0x158   : > { %v1721_v60 = vld [vmem:[#allocation2 + $0xb2] sm:$0xff]  ;;  %v1657_v15 = vmul.f32 %v2593_v57, %v1624_v27  ;;  %v1367_v28 = vmul.f32 %v1624_v27, %v2560_v34  ;;  %v1704_v0 = vadd.f32 %v1672_v9, %v1607_v36  ;;  %v1011_v52 = vmul.f32 %v2517_v1, %v3092_v63 }
 0x159   : > { %v1754_v46 = vmul.f32 %v2607_v13, %v1721_v60  ;;  %v1464_v7 = vmul.f32 %v1721_v60, %v2578_v47  ;;  %v1076_v29 = vmul.f32 %v1623_v38, %v2519_v2  ;;  %v1414_v4 = vadd.f32 %v1382_v40, %v1317_v30 }
 0x15a   : > { %v1689_v59 = vadd.f32 %v1657_v15, %v1592_v56  ;;  %v1399_v22 = vadd.f32 %v1367_v28, %v1302_v37  ;;  %v1012_v53 = vmul.f32 %v2517_v1, %v3119_v51  ;;  %v1077_v56 = vmul.f32 %v1624_v27, %v2519_v2  ;;  %v3232_v15 = vld [vmem:[#allocation2 + $0x189] sm:$0xff] }
 0x15b   : > { %v1853_v33 = vmax.f32 %v1821_v5, 0.0  ;;  %v1593_v20 = vadd.f32 %v2636_v44, %v1495_v18  ;;  %v1108_v36 = vadd.f32 %v1076_v29, %v1011_v52  ;;  %v1801_v37 = vadd.f32 %v1769_v24, %v1704_v0 }
 0x15c   : > { %v1786_v16 = vadd.f32 %v1754_v46, %v1689_v59  ;;  %v1496_v19 = vadd.f32 %v1464_v7, %v1399_v22  ;;  %v1109_v63 = vadd.f32 %v1077_v56, %v1012_v53  ;;  %v1173_v38 = vmul.f32 %v3171_v49, %v2531_v11  ;;  %v1738_v56 = vld [vmem:[#allocation2 + $0x182] sm:$0xff] }
 0x15d   : > { %v1174_v44 = vmul.f32 %v1721_v60, %v2531_v11  ;;  %v1511_v5 = vadd.f32 %v1479_v31, %v1414_v4  ;;  %v1690_v0 = vadd.f32 %v2650_v62, %v1593_v20  ;;  %v1739_v60 = vld [vmem:[#allocation2 + $0x18a] sm:$0xff]  ;;  %v1837_v52 = vadd.f32 %v3136_v61, %v1801_v37 }
 0x15e   : > { %v1822_v32 = vadd.f32 %v3136_v61, %v1786_v16  ;;  %v1640_v42 = vld [vmem:[#allocation2 + $0x171] sm:$0xff]  ;;  %v1594_v27 = vadd.f32 %v2639_v50, %v1496_v19  ;;  %v1205_v49 = vadd.f32 %v1173_v38, %v1108_v36  ;;  %v1675_v50 = vmul.f32 %v2593_v57, %v3232_v15 }
 0x15f   : > { %v1737_v9 = vld [vmem:[#allocation2 + $0x172] sm:$0xff]  ;;  %v1673_v14 = vmul.f32 %v2593_v57, %v1640_v42  ;;  %v1383_v30 = vmul.f32 %v1640_v42, %v2560_v34  ;;  %v1206_v59 = vadd.f32 %v1174_v44, %v1109_v63  ;;  %v1027_v31 = vmul.f32 %v2517_v1, %v3125_v55 }
 0x160   : > { %v1770_v51 = vmul.f32 %v2607_v13, %v1737_v9  ;;  %v1854_v18 = vmax.f32 %v1822_v32, 0.0  ;;  %v1480_v40 = vmul.f32 %v1737_v9, %v2578_v47  ;;  %v1691_v28 = vadd.f32 %v2689_v41, %v1594_v27  ;;  %v3486_v36 = vld [vmem:[#allocation3_spill] sm:$0xff] }
 0x161   : > { %v1705_v24 = vadd.f32 %v1673_v14, %v1608_v35  ;;  %v1415_v22 = vadd.f32 %v1383_v30, %v1318_v43  ;;  %v1303_v29 = vadd.f32 %v2695_v25, %v1205_v49  ;;  %v1304_v35 = vadd.f32 %v2677_v21, %v1206_v59  ;;  %v3257_v21 = vld [vmem:[%s3477_s6] ss:$0 sm:$0xff] }
 0x162   : > { %v1880_v46 = vpack.c.bf16 %v1854_v18, %v1853_v33  ;;  %v1028_v62 = vmul.f32 %v2517_v1, %v3149_v10  ;;  %v1092_v43 = vmul.f32 %v3190_v8, %v2519_v2  ;;  %v1788_v4 = vadd.f32 %v2692_v39, %v1691_v28  ;;  %v3488_v18 = vld [vmem:[#allocation7_spill] sm:$0xff]  ;;  %v3276_v30 = vld [vmem:[#allocation2 + $0xe0] sm:$0xff] }
 0x163   : > { %v1802_v7 = vadd.f32 %v1770_v51, %v1705_v24  ;;  %v1512_v41 = vadd.f32 %v1480_v40, %v1415_v22  ;;  %v1609_v53 = vadd.f32 %v1577_v6, %v1511_v5  ;;  %v1772_v25 = vmul.f32 %v2607_v13, %v1739_v60  ;;  %v3487_v6 = vld [vmem:[#allocation4_spill] sm:$0xff]  ;;  %v3489_v59 = vld [vmem:[#allocation5_spill] sm:$0xff] }
 0x164   : > { %1992 = vmatmul.bf16.gmra.mxu1 %v1880_v46  ;;  %v1401_v10 = vadd.f32 %v2702_v58, %v1304_v35  ;;  %v1093_v33 = vmul.f32 %v1640_v42, %v2519_v2  ;;  %v1124_v8 = vadd.f32 %v1092_v43, %v1027_v31  ;;  %v1869_v19 = vmax.f32 %v1837_v52, 0.0  ;;  %v3297_v31 = vld [vmem:[#allocation2 + $0xd9] sm:$0xff] }
 0x165   : > { %v1838_v16 = vadd.f32 %v3136_v61, %v1802_v7  ;;  %v1610_v55 = vadd.f32 %v1578_v54, %v1512_v41  ;;  %v1787_v39 = vadd.f32 %v3486_v36, %v1690_v0  ;;  %v1400_v32 = vadd.f32 %v3487_v6, %v1303_v29  ;;  %v3288_v0 = vld [vmem:[#allocation2 + $0xd8] sm:$0xff] }
 0x166   : > { %v1125_v63 = vadd.f32 %v1093_v33, %v1028_v62  ;;  %v1189_v38 = vmul.f32 %v3198_v45, %v2531_v11  ;;  %v1190_v14 = vmul.f32 %v1737_v9, %v2531_v11  ;;  %v1824_v42 = vadd.f32 %v3136_v61, %v1788_v4  ;;  %v1643_v43 = vld [vmem:[#allocation2 + $0x199] sm:$0xff] }
 0x167   : > { %v1870_v20 = vmax.f32 %v1838_v16, 0.0  ;;  %v1707_v37 = vadd.f32 %v1675_v50, %v1610_v55  ;;  %v1706_v51 = vadd.f32 %v3204_v3, %v1609_v53  ;;  %v1771_v27 = vmul.f32 %v2607_v13, %v1738_v56  ;;  %v1644_v16 = vld [vmem:[#allocation2 + $0x1a1] sm:$0xff] }
 0x168   : > { %v1498_v45 = vadd.f32 %v3488_v18, %v1401_v10  ;;  %v1221_v9 = vadd.f32 %v1189_v38, %v1124_v8  ;;  %v1222_v40 = vadd.f32 %v1190_v14, %v1125_v63  ;;  %v1823_v5 = vadd.f32 %v3136_v61, %v1787_v39 }
 0x169   : > { %v1968_v58 = vpop.f32.mrf.mxu1  ;;  %v1888_v54 = vpack.c.bf16 %v1870_v20, %v1869_v19  ;;  %v1564_v24 = vmul.f32 %v2580_v48, %v3276_v30  ;;  %v1287_v28 = vmul.f32 %v2546_v23, %v3001_v12  ;;  %v1288_v3 = vmul.f32 %v2546_v23, %v3031_v26  ;;  %v1741_v19 = vld [vmem:[#allocation2 + $0x1a2] sm:$0xff] }
 0x16a   : > { %v1969_v44 = vadd.f32 %v3257_v21, %v1968_v58  ;;  %v1804_v49 = vadd.f32 %v1772_v25, %v1707_v37  ;;  %v1497_v46 = vadd.f32 %v3489_v59, %v1400_v32  ;;  %v1384_v22 = vmul.f32 %v3188_v17, %v2560_v34  ;;  %v3300_v17 = vld [vmem:[#allocation2 + $0xe1] sm:$0xff] }
 0x16b   : > { %2032 = vmatmul.bf16.gmra.mxu3 %v1888_v54  ;;  %v1385_v50 = vmul.f32 %v3232_v15, %v2560_v34  ;;  %v1563_v7 = vmul.f32 %v2580_v48, %v3288_v0  ;;  %v1319_v12 = vadd.f32 %v1287_v28, %v1221_v9  ;;  %v1320_v52 = vadd.f32 %v1288_v3, %v1222_v40  ;;  %v2288_v25 = vld [vmem:[#allocation2] sm:$0xff] }
 0x16c   : > { %2048 = vst.msk [vmem:[%s3269_s30] sm:$0xff] %vm394_vm1, %v1969_v44  ;;  %v1481_v26 = vmul.f32 %v1738_v56, %v2578_v47  ;;  %v1856_v29 = vmax.f32 %v1824_v42, 0.0  ;;  %v1803_v35 = vadd.f32 %v1771_v27, %v1706_v51  ;;  %v1596_v41 = vadd.f32 %v1564_v24, %v1498_v45  ;;  %v3312_v58 = vld [vmem:[#allocation2 + $0xe2] sm:$0xff]  ;;  %v1724_v40 = vld [vmem:[#allocation2 + $0xda] sm:$0xff] }
 0x16d   : > { %v1482_v62 = vmul.f32 %v1739_v60, %v2578_v47  ;;  %v1660_v15 = vmul.f32 %v2593_v57, %v3297_v31  ;;  %v1416_v4 = vadd.f32 %v1384_v22, %v1319_v12  ;;  %v1417_v53 = vadd.f32 %v1385_v50, %v1320_v52  ;;  %v1740_v60 = vld [vmem:[#allocation2 + $0x19a] sm:$0xff] }
 0x16e   : > { %v1579_v55 = vmul.f32 %v2288_v25, %v2580_v48  ;;  %v1855_v56 = vmax.f32 %v1823_v5, 0.0  ;;  %v1840_v10 = vadd.f32 %v3136_v61, %v1804_v49  ;;  %v1595_v33 = vadd.f32 %v1563_v7, %v1497_v46  ;;  %v3490_v59 = vld [vmem:[#allocation9_spill] sm:$0xff]  ;;  %v3491_v46 = vld [vmem:[#allocation8_spill] sm:$0xff] }
 0x16f   : > { %v1661_v8 = vmul.f32 %v2593_v57, %v3300_v17  ;;  %v1513_v36 = vadd.f32 %v1481_v26, %v1416_v4  ;;  %v1514_v39 = vadd.f32 %v1482_v62, %v1417_v53  ;;  %v1676_v6 = vmul.f32 %v2593_v57, %v1643_v43  ;;  %v1533_v53 = vld [vmem:[#allocation2 + $0xf8] sm:$0xff] }
 0x170   : > { %v1677_v32 = vmul.f32 %v2593_v57, %v1644_v16  ;;  %v1881_v63 = vpack.c.bf16 %v1856_v29, %v1855_v56  ;;  %v1839_v38 = vadd.f32 %v3136_v61, %v1803_v35  ;;  %v1773_v51 = vmul.f32 %v2607_v13, %v1740_v60 }
 0x171   : > { %v1970_v20 = vpop.f32.mrf.mxu1  ;;  %v1693_v14 = vadd.f32 %v1661_v8, %v1596_v41  ;;  %v1611_v54 = vadd.f32 %v1579_v55, %v1513_v36  ;;  %v1612_v42 = vadd.f32 %v1579_v55, %v1514_v39  ;;  %v1774_v27 = vmul.f32 %v2607_v13, %v1741_v19 }
 0x172   : > { %v1971_v37 = vadd.f32 %v3257_v21, %v1970_v20  ;;  %v1692_v44 = vadd.f32 %v1660_v15, %v1595_v33  ;;  %v1758_v18 = vmul.f32 %v2607_v13, %v3312_v58  ;;  %v1274_v45 = vmul.f32 %v3276_v30, %v2546_v23  ;;  %v619_v7 = vpop.f32.mrf.mxu3  ;;  %v3492_v15 = vld [vmem:[#allocation6_spill] sm:$0xff]  ;;  %v1630_v20 = vld [vmem:[#allocation2 + $0xf9] sm:$0xff] }
 0x173   : > { %v1872_v9 = vmax.f32 %v1840_v10, 0.0  ;;  %v1708_v5 = vadd.f32 %v1676_v6, %v1611_v54  ;;  %v1709_v24 = vadd.f32 %v1677_v32, %v1612_v42  ;;  %v1273_v28 = vmul.f32 %v3288_v0, %v2546_v23  ;;  %v1532_v10 = vld [vmem:[#allocation2 + $0xf0] sm:$0xff] }
 0x174   : > { %2049 = vst.msk [vmem:[%s3269_s30 + $0x8] sm:$0xff] %vm394_vm1, %v1971_v37  ;;  %1997 = vmatmul.bf16.gmra.mxu1 %v1881_v63  ;;  %v1757_v3 = vmul.f32 %v2607_v13, %v1724_v40  ;;  %v1790_v49 = vadd.f32 %v1758_v18, %v1693_v14  ;;  %v1208_v22 = vadd.f32 %v3491_v46, %v3490_v59  ;;  %v1871_v12 = vmax.f32 %v1839_v38, 0.0  ;;  %v1629_v37 = vld [vmem:[#allocation2 + $0xf1] sm:$0xff] }
 0x175   : > { %v1371_v50 = vmul.f32 %v3300_v17, %v2560_v34  ;;  %v1805_v52 = vadd.f32 %v1773_v51, %v1708_v5  ;;  %v1806_v26 = vadd.f32 %v1774_v27, %v1709_v24  ;;  %v1370_v29 = vmul.f32 %v3297_v31, %v2560_v34 }
 0x176   : > { %v1789_v35 = vadd.f32 %v1757_v3, %v1692_v44  ;;  %v1306_v41 = vadd.f32 %v1274_v45, %v1208_v22  ;;  %v1889_v62 = vpack.c.bf16 %v1872_v9, %v1871_v12  ;;  %v1305_v4 = vadd.f32 %v1273_v28, %v3492_v15  ;;  %v1727_v44 = vld [vmem:[#allocation2 + $0xfa] sm:$0xff]  ;;  %v1726_v28 = vld [vmem:[#allocation2 + $0xf2] sm:$0xff] }
 0x177   : > { %v1841_v43 = vadd.f32 %v3136_v61, %v1805_v52  ;;  %v1842_v16 = vadd.f32 %v3136_v61, %v1806_v26  ;;  %v1826_v25 = vadd.f32 %v3136_v61, %v1790_v49  ;;  %v1468_v56 = vmul.f32 %v3312_v58, %v2578_v47 }
 0x178   : > { %v1403_v55 = vadd.f32 %v1371_v50, %v1306_v41  ;;  %v1402_v60 = vadd.f32 %v1370_v29, %v1305_v4  ;;  %v1467_v19 = vmul.f32 %v1724_v40, %v2578_v47  ;;  %v1825_v36 = vadd.f32 %v3136_v61, %v1789_v35 }
 0x179   : > { %v1873_v33 = vmax.f32 %v1841_v43, 0.0  ;;  %v1874_v8 = vmax.f32 %v1842_v16, 0.0  ;;  %v1566_v39 = vmul.f32 %v2580_v48, %v1533_v53  ;;  %v1565_v32 = vmul.f32 %v2580_v48, %v1532_v10  ;;  %v1535_v43 = vld [vmem:[#allocation2 + $0x110] sm:$0xff] }
 0x17a   : > { %v1016_v63 = vmul.f32 %v3276_v30, %v2517_v1  ;;  %v1081_v38 = vmul.f32 %v3300_v17, %v2519_v2  ;;  %v1858_v14 = vmax.f32 %v1826_v25, 0.0  ;;  %v1500_v54 = vadd.f32 %v1468_v56, %v1403_v55  ;;  %v621_v51 = vpop.f32.mrf.mxu3  ;;  %v1632_v25 = vld [vmem:[#allocation2 + $0x111] sm:$0xff] }
 0x17b   : > { %2037 = vmatmul.bf16.gmra.mxu3 %v1889_v62  ;;  %v1890_v6 = vpack.c.bf16 %v1874_v8, %v1873_v33  ;;  %v1663_v42 = vmul.f32 %v2593_v57, %v1630_v20  ;;  %v1499_v27 = vadd.f32 %v1467_v19, %v1402_v60  ;;  %v1015_v18 = vmul.f32 %v3288_v0, %v2517_v1  ;;  %v1631_v33 = vld [vmem:[#allocation2 + $0x109] sm:$0xff] }
 0x17c   : > { %v1080_v45 = vmul.f32 %v3297_v31, %v2519_v2  ;;  %v1857_v9 = vmax.f32 %v1825_v36, 0.0  ;;  %v1598_v5 = vadd.f32 %v1566_v39, %v1500_v54  ;;  %v1662_v30 = vmul.f32 %v2593_v57, %v1629_v37  ;;  %v1729_v36 = vld [vmem:[#allocation2 + $0x112] sm:$0xff] }
 0x17d   : > { %v1597_v17 = vadd.f32 %v1565_v32, %v1499_v27  ;;  %v1113_v3 = vadd.f32 %v1081_v38, %v1016_v63  ;;  %v1178_v49 = vmul.f32 %v3312_v58, %v2531_v11  ;;  %v1760_v1 = vmul.f32 %v2607_v13, %v1727_v44  ;;  %v1728_v63 = vld [vmem:[#allocation2 + $0x10a] sm:$0xff] }
 0x17e   : > { %v1882_v46 = vpack.c.bf16 %v1858_v14, %v1857_v9  ;;  %v1695_v22 = vadd.f32 %v1663_v42, %v1598_v5  ;;  %v1112_v0 = vadd.f32 %v1080_v45, %v1015_v18  ;;  %v1177_v2 = vmul.f32 %v1724_v40, %v2531_v11 }
 0x17f   : > { %v1694_v31 = vadd.f32 %v1662_v30, %v1597_v17  ;;  %v1759_v50 = vmul.f32 %v2607_v13, %v1726_v28  ;;  %v1276_v7 = vmul.f32 %v1533_v53, %v2546_v23  ;;  %v1275_v12 = vmul.f32 %v1532_v10, %v2546_v23  ;;  %v1534_v53 = vld [vmem:[#allocation2 + $0x108] sm:$0xff] }
 0x180   : > { %v1792_v58 = vadd.f32 %v1760_v1, %v1695_v22  ;;  %v1210_v52 = vadd.f32 %v1178_v49, %v1113_v3  ;;  %v1373_v26 = vmul.f32 %v1630_v20, %v2560_v34  ;;  %v1209_v29 = vadd.f32 %v1177_v2, %v1112_v0 }
 0x181   : > { %v1973_v24 = vpop.f32.mrf.mxu1  ;;  %v1791_v35 = vadd.f32 %v1759_v50, %v1694_v31  ;;  %v1372_v11 = vmul.f32 %v1629_v37, %v2560_v34  ;;  %v1470_v23 = vmul.f32 %v1727_v44, %v2578_v47  ;;  %v1469_v34 = vmul.f32 %v1726_v28, %v2578_v47 }
 0x182   : > { %v1974_v59 = vadd.f32 %v3257_v21, %v1973_v24  ;;  %v1308_v41 = vadd.f32 %v1276_v7, %v1210_v52  ;;  %v1307_v62 = vadd.f32 %v1275_v12, %v1209_v29  ;;  %v1828_v15 = vadd.f32 %v3136_v61, %v1792_v58 }
 0x183   : > { %v1827_v55 = vadd.f32 %v3136_v61, %v1791_v35  ;;  %v1568_v10 = vmul.f32 %v2580_v48, %v1535_v43  ;;  %v1567_v19 = vmul.f32 %v2580_v48, %v1534_v53  ;;  %v1665_v20 = vmul.f32 %v2593_v57, %v1632_v25 }
 0x184   : > { %2050 = vst.msk [vmem:[%s3269_s30 + $0x10] sm:$0xff] %vm394_vm1, %v1974_v59  ;;  %2002 = vmatmul.bf16.gmra.mxu1 %v1882_v46  ;;  %v1405_v4 = vadd.f32 %v1373_v26, %v1308_v41  ;;  %v1404_v56 = vadd.f32 %v1372_v11, %v1307_v62  ;;  %v1860_v8 = vmax.f32 %v1828_v15, 0.0  ;;  %v1664_v37 = vmul.f32 %v2593_v57, %v1631_v33 }
 0x185   : > { %v1859_v39 = vmax.f32 %v1827_v55, 0.0  ;;  %v1762_v54 = vmul.f32 %v2607_v13, %v1729_v36  ;;  %v1761_v48 = vmul.f32 %v2607_v13, %v1728_v63 }
 0x186   : > { %v1502_v60 = vadd.f32 %v1470_v23, %v1405_v4 }
 0x187   : > { %v1883_v38 = vpack.c.bf16 %v1860_v8, %v1859_v39 }
 0x188   : > { %v1600_v32 = vadd.f32 %v1568_v10, %v1502_v60 }
 0x189   : > { %v1975_v40 = vpop.f32.mrf.mxu1 }
 0x18a   : > { %v1976_v16 = vadd.f32 %v3257_v21, %v1975_v40  ;;  %v1697_v47 = vadd.f32 %v1665_v20, %v1600_v32 }
 0x18b   : > { %2042 = vmatmul.bf16.gmra.mxu3 %v1890_v6  ;;  %v1501_v6 = vadd.f32 %v1469_v34, %v1404_v56 }
 0x18c   : > { %2051 = vst.msk [vmem:[%s3269_s30 + $0x18] sm:$0xff] %vm394_vm1, %v1976_v16  ;;  %v1794_v51 = vadd.f32 %v1762_v54, %v1697_v47 }
 0x18d   : > { %v1599_v14 = vadd.f32 %v1567_v19, %v1501_v6 }
 0x18e   : > { %v1830_v57 = vadd.f32 %v3136_v61, %v1794_v51 }
 0x18f   : > { %v1696_v42 = vadd.f32 %v1664_v37, %v1599_v14 }
 0x190   : > { %v1862_v9 = vmax.f32 %v1830_v57, 0.0 }
 0x191   : > { %v1793_v27 = vadd.f32 %v1761_v48, %v1696_v42 }
 0x193   : > { %v1829_v45 = vadd.f32 %v3136_v61, %v1793_v27 }
 0x194   : > { %2007 = vmatmul.bf16.gmra.mxu1 %v1883_v38 }
 0x195   : > { %v1861_v5 = vmax.f32 %v1829_v45, 0.0 }
 0x197   : > { %v1884_v24 = vpack.c.bf16 %v1862_v9, %v1861_v5 }
 0x199   : > { %v1978_v44 = vpop.f32.mrf.mxu1 }
 0x19a   : > { %v1979_v18 = vadd.f32 %v3257_v21, %v1978_v44 }
 0x19c   : > { %2052 = vst.msk [vmem:[%s3269_s30 + $0x20] sm:$0xff] %vm394_vm1, %v1979_v18 }
 0x1a1   : > { %v1980_v30 = vpop.f32.mrf.mxu1 }
 0x1a2   : > { %v1981_v13 = vadd.f32 %v3257_v21, %v1980_v30 }
 0x1a4   : > { %2053 = vst.msk [vmem:[%s3269_s30 + $0x28] sm:$0xff] %vm394_vm1, %v1981_v13  ;;  %2012 = vmatmul.bf16.gmra.mxu1 %v1884_v24 }
 0x1a6   : > { %v2018_v17 = vpop.f32.mrf.mxu3 }
 0x1a7   : > { %v2019_v28 = vadd.f32 %v3257_v21, %v2018_v17 }
 0x1a9   : > { %2068 = vst.msk [vmem:[%s3269_s30 + $0xa0] sm:$0xff] %vm394_vm1, %v2019_v28 }
 0x1ae   : > { %v2020_v3 = vpop.f32.mrf.mxu3 }
 0x1af   : > { %v2021_v61 = vadd.f32 %v3257_v21, %v2020_v3 }
 0x1b1   : > { %2069 = vst.msk [vmem:[%s3269_s30 + $0xa8] sm:$0xff] %vm394_vm1, %v2021_v61  ;;  %v1983_v49 = vpop.f32.mrf.mxu1 }
 0x1b2   : > { %v1984_v59 = vadd.f32 %v3257_v21, %v1983_v49 }
 0x1b4   : > { %2054 = vst.msk [vmem:[%s3269_s30 + $0x30] sm:$0xff] %vm394_vm1, %v1984_v59 }
 0x1b9   : > { %v1985_v46 = vpop.f32.mrf.mxu1 }
 0x1ba   : > { %v1986_v22 = vadd.f32 %v3257_v21, %v1985_v46 }
 0x1bc   : > { %2055 = vst.msk [vmem:[%s3269_s30 + $0x38] sm:$0xff] %vm394_vm1, %v1986_v22 }
 0x1be   : > { %v2023_v1 = vpop.f32.mrf.mxu3 }
 0x1bf   : > { %v2024_v0 = vadd.f32 %v3257_v21, %v2023_v1 }
 0x1c1   : > { %2070 = vst.msk [vmem:[%s3269_s30 + $0xb0] sm:$0xff] %vm394_vm1, %v2024_v0 }
 0x1c6   : > { %v2025_v2 = vpop.f32.mrf.mxu3 }
 0x1c7   : > { %v2026_v31 = vadd.f32 %v3257_v21, %v2025_v2 }
 0x1c9   : > { %2071 = vst.msk [vmem:[%s3269_s30 + $0xb8] sm:$0xff] %vm394_vm1, %v2026_v31  ;;  %v1988_v50 = vpop.f32.mrf.mxu1 }
 0x1ca   : > { %v1989_v7 = vadd.f32 %v3257_v21, %v1988_v50 }
 0x1cc   : > { %2056 = vst.msk [vmem:[%s3269_s30 + $0x40] sm:$0xff] %vm394_vm1, %v1989_v7 }
 0x1d1   : > { %v1990_v12 = vpop.f32.mrf.mxu1 }
 0x1d2   : > { %v1991_v58 = vadd.f32 %v3257_v21, %v1990_v12 }
 0x1d4   : > { %2057 = vst.msk [vmem:[%s3269_s30 + $0x48] sm:$0xff] %vm394_vm1, %v1991_v58 }
 0x1d6   : > { %v2028_v52 = vpop.f32.mrf.mxu3 }
 0x1d7   : > { %v2029_v26 = vadd.f32 %v3257_v21, %v2028_v52 }
 0x1d9   : > { %2072 = vst.msk [vmem:[%s3269_s30 + $0xc0] sm:$0xff] %vm394_vm1, %v2029_v26 }
 0x1de   : > { %v2030_v29 = vpop.f32.mrf.mxu3 }
 0x1df   : > { %v2031_v35 = vadd.f32 %v3257_v21, %v2030_v29 }
 0x1e1   : > { %2073 = vst.msk [vmem:[%s3269_s30 + $0xc8] sm:$0xff] %vm394_vm1, %v2031_v35  ;;  %v1993_v41 = vpop.f32.mrf.mxu1 }
 0x1e2   : > { %v1994_v11 = vadd.f32 %v3257_v21, %v1993_v41 }
 0x1e4   : > { %2058 = vst.msk [vmem:[%s3269_s30 + $0x50] sm:$0xff] %vm394_vm1, %v1994_v11 }
 0x1e9   : > { %v1995_v40 = vpop.f32.mrf.mxu1 }
 0x1ea   : > { %v1996_v62 = vadd.f32 %v3257_v21, %v1995_v40 }
 0x1ec   : > { %2059 = vst.msk [vmem:[%s3269_s30 + $0x58] sm:$0xff] %vm394_vm1, %v1996_v62 }
 0x1ee   : > { %v2033_v43 = vpop.f32.mrf.mxu3 }
 0x1ef   : > { %v2034_v16 = vadd.f32 %v3257_v21, %v2033_v43 }
 0x1f1   : > { %2074 = vst.msk [vmem:[%s3269_s30 + $0xd0] sm:$0xff] %vm394_vm1, %v2034_v16  ;;  %v1998_v15 = vpop.f32.mrf.mxu1 }
 0x1f2   : > { %v1999_v4 = vadd.f32 %v3257_v21, %v1998_v15 }
 0x1f4   : > { %2060 = vst.msk [vmem:[%s3269_s30 + $0x60] sm:$0xff] %vm394_vm1, %v1999_v4 }
 0x1f6   : > { %v2035_v23 = vpop.f32.mrf.mxu3 }
 0x1f7   : > { %v2036_v53 = vadd.f32 %v3257_v21, %v2035_v23 }
 0x1f9   : > { %2075 = vst.msk [vmem:[%s3269_s30 + $0xd8] sm:$0xff] %vm394_vm1, %v2036_v53  ;;  %v2000_v25 = vpop.f32.mrf.mxu1 }
 0x1fa   : > { %v2001_v55 = vadd.f32 %v3257_v21, %v2000_v25 }
 0x1fc   : > { %2061 = vst.msk [vmem:[%s3269_s30 + $0x68] sm:$0xff] %vm394_vm1, %v2001_v55 }
 0x1fe   : > { %v2038_v56 = vpop.f32.mrf.mxu3 }
 0x1ff   : > { %v2039_v34 = vadd.f32 %v3257_v21, %v2038_v56 }
 0x201   : > { %2076 = vst.msk [vmem:[%s3269_s30 + $0xe0] sm:$0xff] %vm394_vm1, %v2039_v34  ;;  %v2003_v10 = vpop.f32.mrf.mxu1 }
 0x202   : > { %v2004_v33 = vadd.f32 %v3257_v21, %v2003_v10 }
 0x204   : > { %2062 = vst.msk [vmem:[%s3269_s30 + $0x70] sm:$0xff] %vm394_vm1, %v2004_v33 }
 0x206   : > { %v2040_v8 = vpop.f32.mrf.mxu3 }
 0x207   : > { %v2041_v60 = vadd.f32 %v3257_v21, %v2040_v8 }
 0x209   : > { %2077 = vst.msk [vmem:[%s3269_s30 + $0xe8] sm:$0xff] %vm394_vm1, %v2041_v60  ;;  %v2005_v19 = vpop.f32.mrf.mxu1 }
 0x20a   : > { %v2006_v20 = vadd.f32 %v3257_v21, %v2005_v19 }
 0x20c   : > { %2063 = vst.msk [vmem:[%s3269_s30 + $0x78] sm:$0xff] %vm394_vm1, %v2006_v20 }
 0x20e   : > { %v2043_v36 = vpop.f32.mrf.mxu3 }
 0x20f   : > { %v2044_v39 = vadd.f32 %v3257_v21, %v2043_v36 }
 0x211   : > { %2078 = vst.msk [vmem:[%s3269_s30 + $0xf0] sm:$0xff] %vm394_vm1, %v2044_v39  ;;  %v2008_v6 = vpop.f32.mrf.mxu1 }
 0x212   : > { %v2009_v32 = vadd.f32 %v3257_v21, %v2008_v6 }
 0x214   : > { %2064 = vst.msk [vmem:[%s3269_s30 + $0x80] sm:$0xff] %vm394_vm1, %v2009_v32 }
 0x216   : > { %v2045_v37 = vpop.f32.mrf.mxu3 }
 0x217   : > { %v2046_v63 = vadd.f32 %v3257_v21, %v2045_v37 }
 0x219   : > { %2079 = vst.msk [vmem:[%s3269_s30 + $0xf8] sm:$0xff] %vm394_vm1, %v2046_v63  ;;  %v2010_v38 = vpop.f32.mrf.mxu1 }
 0x21a   : > { %v2011_v14 = vadd.f32 %v3257_v21, %v2010_v38 }
 0x21c   : > { %2065 = vst.msk [vmem:[%s3269_s30 + $0x88] sm:$0xff] %vm394_vm1, %v2011_v14 }
 0x221   : > { %v2013_v47 = vpop.f32.mrf.mxu1 }
 0x222   : > { %v2014_v54 = vadd.f32 %v3257_v21, %v2013_v47 }
 0x224   : > { %2066 = vst.msk [vmem:[%s3269_s30 + $0x90] sm:$0xff] %vm394_vm1, %v2014_v54 }
 0x229   : > { %v2015_v42 = vpop.f32.mrf.mxu1 }
 0x22a   : > { %v2016_v48 = vadd.f32 %v3257_v21, %v2015_v42 }
 0x22c   : > { %2067 = vst.msk [vmem:[%s3269_s30 + $0x98] sm:$0xff] %vm394_vm1, %v2016_v48 }
 0x22d PF: > { %s17_s26 = sadd.s32 1, %s2311_s26   ;;  %s3493_s24 = smov %s2307_s25 }
 0x22e   : > { %p14_p5 = scmp.ge.s32.totalorder %s17_s26, 4   ;;  %s3494_s25 = smov %s3496_s27 }
 0x230   :  { %16 = sbr.rel (!%p14_p5) target bundleno = 2 (0x2), region = 81 }

</bundles_post_ra>
